<compile_context>
chip_gen: v7x
topology: tpu7x:2x2x1
jax: 0.10.0
libtpu: 0.0.40
codegen_flags: <defaults>
</compile_context>

<pallas_src>
import jax
import jax.numpy as jnp
from jax import lax
from jax.experimental import pallas as pl
from jax.experimental.pallas import tpu as pltpu


def _lstm_stack_kernel(x_ref, wih0_ref, whh0_ref, b0_ref,
                       wih_r_ref, whh_r_ref, br_ref,
                       wout_ref, bout_ref,
                       out_ref):
    """Full stacked-LSTM + final Linear, single grid point, all in VMEM.

    x_ref     : (S, B, D_in)
    wih0_ref  : (D_in, 4H)     layer-0 input weights (pre-transposed)
    whh0_ref  : (H, 4H)        layer-0 recurrent weights
    b0_ref    : (1, 4H)        layer-0 combined bias (b_ih + b_hh)
    wih_r_ref : (L-1, H, 4H)   layers 1..L-1 input weights
    whh_r_ref : (L-1, H, 4H)   layers 1..L-1 recurrent weights
    br_ref    : (L-1, 1, 4H)   layers 1..L-1 combined biases
    wout_ref  : (H, G)         hidden2gesture weight (pre-transposed)
    bout_ref  : (1, G)         hidden2gesture bias
    out_ref   : (B, G)
    """
    S, B, D = x_ref.shape
    H = whh0_ref.shape[0]
    L_rest = wih_r_ref.shape[0]

    def run_layer(proj, whh):
        """proj: (S, B, 4H) = x_t @ W_ih + (b_ih + b_hh) for all t (hoisted).

        Only h @ W_hh + activations remain on the serial chain.
        Hidden sequence is kept in registers (no VMEM round-trips).
        """
        h = jnp.zeros((B, H), jnp.float32)
        c = jnp.zeros((B, H), jnp.float32)
        hs = []
        for t in range(S):  # static unroll: S is small, chain is serial anyway
            gates = proj[t] + jnp.dot(h, whh,
                                      preferred_element_type=jnp.float32)
            # Full 128-lane-width activations; sigmoid via tanh (1 EUP push).
            sig = 0.5 * (jnp.tanh(0.5 * gates) + 1.0)   # i, f, o gates
            th = jnp.tanh(gates)                        # g gate
            i = sig[:, 0:H]
            f = sig[:, H:2 * H]
            g = th[:, 2 * H:3 * H]
            o = sig[:, 3 * H:4 * H]
            c = f * c + i * g
            h = o * jnp.tanh(c)
            hs.append(h)
        return jnp.stack(hs, axis=0)                    # (S, B, H)

    # ---- layer 0 (input_size -> hidden): hoisted input projection ----
    x_flat = x_ref[...].reshape(S * B, D)
    proj0 = (jnp.dot(x_flat, wih0_ref[...],
                     preferred_element_type=jnp.float32)
             + b0_ref[...]).reshape(S, B, 4 * H)
    hseq = run_layer(proj0, whh0_ref[...])

    # ---- layers 1 .. L-1 (hidden -> hidden), dynamic layer indexing ----
    def layer_body(l, hseq):
        wih = wih_r_ref[l]                              # (H, 4H)
        whh = whh_r_ref[l]                              # (H, 4H)
        b = br_ref[l]                                   # (1, 4H)
        proj = (jnp.dot(hseq.reshape(S * B, H), wih,
                        preferred_element_type=jnp.float32)
                + b).reshape(S, B, 4 * H)
        return run_layer(proj, whh)

    hseq = lax.fori_loop(0, L_rest, layer_body, hseq)

    # ---- hidden2gesture on the last time step of the top layer ----
    h_last = hseq[S - 1]
    out_ref[...] = (jnp.dot(h_last, wout_ref[...],
                            preferred_element_type=jnp.float32)
                    + bout_ref[...])


def jarvis_lstm_forward(x, params):
    """x: (S, B, input_size) float32; returns (B, gesture_size) float32."""
    S, B, _ = x.shape
    G = params["wout"].shape[1]

    vmem = pl.BlockSpec(memory_space=pltpu.MemorySpace.VMEM)
    return pl.pallas_call(
        _lstm_stack_kernel,
        out_shape=jax.ShapeDtypeStruct((B, G), jnp.float32),
        in_specs=[vmem] * 9,
        out_specs=vmem,
    )(x, params["wih0"], params["whh0"], params["b0"],
      params["wih_r"], params["whh_r"], params["br"],
      params["wout"], params["bout"])


def init_params(key, hidden_dim, input_size, gesture_size, num_layers):
    """Deterministic init matching the PyTorch module's parameter shapes.

    nn.LSTM(input_size, hidden_dim, num_layers):
      layer 0:   W_ih (4H, input_size), W_hh (4H, H), b_ih (4H,), b_hh (4H,)
      layer >=1: W_ih (4H, H),          W_hh (4H, H), b_ih (4H,), b_hh (4H,)
    nn.Linear(hidden_dim, gesture_size): W (G, H), b (G,)
    Weights are stored pre-transposed for the kernel; biases combined.
    """
    H, G = hidden_dim, gesture_size
    std = 1.0 / jnp.sqrt(jnp.float32(H))
    keys = jax.random.split(key, 8)
    u = lambda k, shape: jax.random.uniform(k, shape, jnp.float32, -std, std)

    wih0 = u(keys[0], (input_size, 4 * H))
    whh0 = u(keys[1], (H, 4 * H))
    b0 = u(keys[2], (1, 4 * H)) + u(keys[3], (1, 4 * H))      # b_ih + b_hh

    Lr = num_layers - 1
    wih_r = u(keys[4], (Lr, H, 4 * H))
    whh_r = u(keys[5], (Lr, H, 4 * H))
    br = u(keys[6], (Lr, 1, 4 * H)) + u(keys[7], (Lr, 1, 4 * H))

    k2 = jax.random.split(jax.random.fold_in(key, 7), 2)
    wout = u(k2[0], (H, G))
    bout = u(k2[1], (1, G))

    return dict(wih0=wih0, whh0=whh0, b0=b0,
                wih_r=wih_r, whh_r=whh_r, br=br,
                wout=wout, bout=bout)


def _reference_forward(x, params):
    """Pure-JAX reference with PyTorch-equivalent semantics (verification)."""
    S, B, _ = x.shape
    H = params["whh0"].shape[0]

    def run_layer(seq, wih, whh, b):
        def step(carry, x_t):
            h, c = carry
            gates = x_t @ wih + h @ whh + b
            i = jax.nn.sigmoid(gates[:, 0:H])
            f = jax.nn.sigmoid(gates[:, H:2 * H])
            g = jnp.tanh(gates[:, 2 * H:3 * H])
            o = jax.nn.sigmoid(gates[:, 3 * H:4 * H])
            c = f * c + i * g
            h = o * jnp.tanh(c)
            return (h, c), h
        init = (jnp.zeros((B, H), jnp.float32), jnp.zeros((B, H), jnp.float32))
        _, hs = jax.lax.scan(step, init, seq)
        return hs

    hs = run_layer(x, params["wih0"], params["whh0"], params["b0"])
    for l in range(params["wih_r"].shape[0]):
        hs = run_layer(hs, params["wih_r"][l], params["whh_r"][l], params["br"][l])
    return hs[-1] @ params["wout"] + params["bout"]


if __name__ == "__main__":
    # Small shapes implied by the module: seq_len=8 (== num LSTM layers),
    # batch=2, input_size=16, hidden_dim=32, gesture_size=8.
    hidden_dim, input_size, gesture_size, seq_len = 32, 16, 8, 8
    batch = 2

    key = jax.random.PRNGKey(0)
    kx, kp = jax.random.split(key)
    x = jax.random.normal(kx, (seq_len, batch, input_size), jnp.float32)
    params = init_params(kp, hidden_dim, input_size, gesture_size, seq_len)

    out = jax.block_until_ready(jarvis_lstm_forward(x, params))
    assert out.shape == (batch, gesture_size), out.shape

    ref = _reference_forward(x, params)
    # Slightly looser tolerance: kernel computes sigmoid as 0.5*(tanh(x/2)+1)
    # (mathematically identical, a few ULP difference in f32).
    assert jnp.allclose(out, ref, rtol=1e-4, atol=1e-4), "mismatch vs reference"

    print("KERNEL_OK")
</pallas_src>

<mosaic_0001>
module attributes {stable_mosaic.version = 11 : i64} {
  func.func @_lstm_stack_kernel(%arg0: memref<8x2x16xf32, #tpu.memory_space<vmem>>, %arg1: memref<16x128xf32, #tpu.memory_space<vmem>>, %arg2: memref<32x128xf32, #tpu.memory_space<vmem>>, %arg3: memref<1x128xf32, #tpu.memory_space<vmem>>, %arg4: memref<7x32x128xf32, #tpu.memory_space<vmem>>, %arg5: memref<7x32x128xf32, #tpu.memory_space<vmem>>, %arg6: memref<7x1x128xf32, #tpu.memory_space<vmem>>, %arg7: memref<32x8xf32, #tpu.memory_space<vmem>>, %arg8: memref<1x8xf32, #tpu.memory_space<vmem>>, %arg9: memref<2x8xf32, #tpu.memory_space<vmem>>) attributes {dimension_semantics = [], scalar_prefetch = 0 : i64, scratch_operands = 0 : i64, tpu.core_type = #tpu.core_type<tc>} {
    %c0 = arith.constant 0 : index
    %c0_0 = arith.constant 0 : index
    %c0_1 = arith.constant 0 : index
    %0 = vector.load %arg0[%c0, %c0_0, %c0_1] : memref<8x2x16xf32, #tpu.memory_space<vmem>>, vector<8x2x16xf32>
    %1 = vector.shape_cast %0 : vector<8x2x16xf32> to vector<16x16xf32>
    %c0_2 = arith.constant 0 : index
    %c0_3 = arith.constant 0 : index
    %2 = vector.load %arg1[%c0_2, %c0_3] : memref<16x128xf32, #tpu.memory_space<vmem>>, vector<16x128xf32>
    %cst = arith.constant dense<0.000000e+00> : vector<16x128xf32>
    %3 = tpu.matmul %1, %2, %cst {dimension_numbers = #tpu.dot_dimension_numbers<[1], [0], [0], [1], [0, 0, 1, 1], [], []>} : vector<16x16xf32>, vector<16x128xf32>, vector<16x128xf32> -> vector<16x128xf32>
    %c0_4 = arith.constant 0 : index
    %c0_5 = arith.constant 0 : index
    %4 = vector.load %arg3[%c0_4, %c0_5] : memref<1x128xf32, #tpu.memory_space<vmem>>, vector<1x128xf32>
    %5 = vector.broadcast %4 : vector<1x128xf32> to vector<16x128xf32>
    %6 = arith.addf %3, %5 : vector<16x128xf32>
    %7 = vector.shape_cast %6 : vector<16x128xf32> to vector<8x2x128xf32>
    %c0_6 = arith.constant 0 : index
    %c0_7 = arith.constant 0 : index
    %8 = vector.load %arg2[%c0_6, %c0_7] : memref<32x128xf32, #tpu.memory_space<vmem>>, vector<32x128xf32>
    %cst_8 = arith.constant 0.000000e+00 : f32
    %9 = vector.broadcast %cst_8 : f32 to vector<2x32xf32>
    %cst_9 = arith.constant 0.000000e+00 : f32
    %10 = vector.broadcast %cst_9 : f32 to vector<2x32xf32>
    %11 = vector.extract_strided_slice %7 {offsets = [0, 0, 0], sizes = [1, 2, 128], strides = [1, 1, 1]} : vector<8x2x128xf32> to vector<1x2x128xf32>
    %12 = vector.shape_cast %11 : vector<1x2x128xf32> to vector<2x128xf32>
    %cst_10 = arith.constant dense<0.000000e+00> : vector<2x128xf32>
    %13 = tpu.matmul %9, %8, %cst_10 {dimension_numbers = #tpu.dot_dimension_numbers<[1], [0], [0], [1], [0, 0, 1, 1], [], []>} : vector<2x32xf32>, vector<32x128xf32>, vector<2x128xf32> -> vector<2x128xf32>
    %14 = arith.addf %12, %13 : vector<2x128xf32>
    %cst_11 = arith.constant 5.000000e-01 : f32
    %15 = vector.broadcast %cst_11 : f32 to vector<2x128xf32>
    %16 = arith.mulf %15, %14 : vector<2x128xf32>
    %17 = math.tanh %16 : vector<2x128xf32>
    %cst_12 = arith.constant 1.000000e+00 : f32
    %18 = vector.broadcast %cst_12 : f32 to vector<2x128xf32>
    %19 = arith.addf %17, %18 : vector<2x128xf32>
    %cst_13 = arith.constant 5.000000e-01 : f32
    %20 = vector.broadcast %cst_13 : f32 to vector<2x128xf32>
    %21 = arith.mulf %20, %19 : vector<2x128xf32>
    %22 = math.tanh %14 : vector<2x128xf32>
    %23 = vector.extract_strided_slice %21 {offsets = [0, 0], sizes = [2, 32], strides = [1, 1]} : vector<2x128xf32> to vector<2x32xf32>
    %24 = vector.extract_strided_slice %21 {offsets = [0, 32], sizes = [2, 32], strides = [1, 1]} : vector<2x128xf32> to vector<2x32xf32>
    %25 = vector.extract_strided_slice %22 {offsets = [0, 64], sizes = [2, 32], strides = [1, 1]} : vector<2x128xf32> to vector<2x32xf32>
    %26 = vector.extract_strided_slice %21 {offsets = [0, 96], sizes = [2, 32], strides = [1, 1]} : vector<2x128xf32> to vector<2x32xf32>
    %27 = arith.mulf %24, %10 : vector<2x32xf32>
    %28 = arith.mulf %23, %25 : vector<2x32xf32>
    %29 = arith.addf %27, %28 : vector<2x32xf32>
    %30 = math.tanh %29 : vector<2x32xf32>
    %31 = arith.mulf %26, %30 : vector<2x32xf32>
    %32 = vector.extract_strided_slice %7 {offsets = [1, 0, 0], sizes = [1, 2, 128], strides = [1, 1, 1]} : vector<8x2x128xf32> to vector<1x2x128xf32>
    %33 = vector.shape_cast %32 : vector<1x2x128xf32> to vector<2x128xf32>
    %cst_14 = arith.constant dense<0.000000e+00> : vector<2x128xf32>
    %34 = tpu.matmul %31, %8, %cst_14 {dimension_numbers = #tpu.dot_dimension_numbers<[1], [0], [0], [1], [0, 0, 1, 1], [], []>} : vector<2x32xf32>, vector<32x128xf32>, vector<2x128xf32> -> vector<2x128xf32>
    %35 = arith.addf %33, %34 : vector<2x128xf32>
    %cst_15 = arith.constant 5.000000e-01 : f32
    %36 = vector.broadcast %cst_15 : f32 to vector<2x128xf32>
    %37 = arith.mulf %36, %35 : vector<2x128xf32>
    %38 = math.tanh %37 : vector<2x128xf32>
    %cst_16 = arith.constant 1.000000e+00 : f32
    %39 = vector.broadcast %cst_16 : f32 to vector<2x128xf32>
    %40 = arith.addf %38, %39 : vector<2x128xf32>
    %cst_17 = arith.constant 5.000000e-01 : f32
    %41 = vector.broadcast %cst_17 : f32 to vector<2x128xf32>
    %42 = arith.mulf %41, %40 : vector<2x128xf32>
    %43 = math.tanh %35 : vector<2x128xf32>
    %44 = vector.extract_strided_slice %42 {offsets = [0, 0], sizes = [2, 32], strides = [1, 1]} : vector<2x128xf32> to vector<2x32xf32>
    %45 = vector.extract_strided_slice %42 {offsets = [0, 32], sizes = [2, 32], strides = [1, 1]} : vector<2x128xf32> to vector<2x32xf32>
    %46 = vector.extract_strided_slice %43 {offsets = [0, 64], sizes = [2, 32], strides = [1, 1]} : vector<2x128xf32> to vector<2x32xf32>
    %47 = vector.extract_strided_slice %42 {offsets = [0, 96], sizes = [2, 32], strides = [1, 1]} : vector<2x128xf32> to vector<2x32xf32>
    %48 = arith.mulf %45, %29 : vector<2x32xf32>
    %49 = arith.mulf %44, %46 : vector<2x32xf32>
    %50 = arith.addf %48, %49 : vector<2x32xf32>
    %51 = math.tanh %50 : vector<2x32xf32>
    %52 = arith.mulf %47, %51 : vector<2x32xf32>
    %53 = vector.extract_strided_slice %7 {offsets = [2, 0, 0], sizes = [1, 2, 128], strides = [1, 1, 1]} : vector<8x2x128xf32> to vector<1x2x128xf32>
    %54 = vector.shape_cast %53 : vector<1x2x128xf32> to vector<2x128xf32>
    %cst_18 = arith.constant dense<0.000000e+00> : vector<2x128xf32>
    %55 = tpu.matmul %52, %8, %cst_18 {dimension_numbers = #tpu.dot_dimension_numbers<[1], [0], [0], [1], [0, 0, 1, 1], [], []>} : vector<2x32xf32>, vector<32x128xf32>, vector<2x128xf32> -> vector<2x128xf32>
    %56 = arith.addf %54, %55 : vector<2x128xf32>
    %cst_19 = arith.constant 5.000000e-01 : f32
    %57 = vector.broadcast %cst_19 : f32 to vector<2x128xf32>
    %58 = arith.mulf %57, %56 : vector<2x128xf32>
    %59 = math.tanh %58 : vector<2x128xf32>
    %cst_20 = arith.constant 1.000000e+00 : f32
    %60 = vector.broadcast %cst_20 : f32 to vector<2x128xf32>
    %61 = arith.addf %59, %60 : vector<2x128xf32>
    %cst_21 = arith.constant 5.000000e-01 : f32
    %62 = vector.broadcast %cst_21 : f32 to vector<2x128xf32>
    %63 = arith.mulf %62, %61 : vector<2x128xf32>
    %64 = math.tanh %56 : vector<2x128xf32>
    %65 = vector.extract_strided_slice %63 {offsets = [0, 0], sizes = [2, 32], strides = [1, 1]} : vector<2x128xf32> to vector<2x32xf32>
    %66 = vector.extract_strided_slice %63 {offsets = [0, 32], sizes = [2, 32], strides = [1, 1]} : vector<2x128xf32> to vector<2x32xf32>
    %67 = vector.extract_strided_slice %64 {offsets = [0, 64], sizes = [2, 32], strides = [1, 1]} : vector<2x128xf32> to vector<2x32xf32>
    %68 = vector.extract_strided_slice %63 {offsets = [0, 96], sizes = [2, 32], strides = [1, 1]} : vector<2x128xf32> to vector<2x32xf32>
    %69 = arith.mulf %66, %50 : vector<2x32xf32>
    %70 = arith.mulf %65, %67 : vector<2x32xf32>
    %71 = arith.addf %69, %70 : vector<2x32xf32>
    %72 = math.tanh %71 : vector<2x32xf32>
    %73 = arith.mulf %68, %72 : vector<2x32xf32>
    %74 = vector.extract_strided_slice %7 {offsets = [3, 0, 0], sizes = [1, 2, 128], strides = [1, 1, 1]} : vector<8x2x128xf32> to vector<1x2x128xf32>
    %75 = vector.shape_cast %74 : vector<1x2x128xf32> to vector<2x128xf32>
    %cst_22 = arith.constant dense<0.000000e+00> : vector<2x128xf32>
    %76 = tpu.matmul %73, %8, %cst_22 {dimension_numbers = #tpu.dot_dimension_numbers<[1], [0], [0], [1], [0, 0, 1, 1], [], []>} : vector<2x32xf32>, vector<32x128xf32>, vector<2x128xf32> -> vector<2x128xf32>
    %77 = arith.addf %75, %76 : vector<2x128xf32>
    %cst_23 = arith.constant 5.000000e-01 : f32
    %78 = vector.broadcast %cst_23 : f32 to vector<2x128xf32>
    %79 = arith.mulf %78, %77 : vector<2x128xf32>
    %80 = math.tanh %79 : vector<2x128xf32>
    %cst_24 = arith.constant 1.000000e+00 : f32
    %81 = vector.broadcast %cst_24 : f32 to vector<2x128xf32>
    %82 = arith.addf %80, %81 : vector<2x128xf32>
    %cst_25 = arith.constant 5.000000e-01 : f32
    %83 = vector.broadcast %cst_25 : f32 to vector<2x128xf32>
    %84 = arith.mulf %83, %82 : vector<2x128xf32>
    %85 = math.tanh %77 : vector<2x128xf32>
    %86 = vector.extract_strided_slice %84 {offsets = [0, 0], sizes = [2, 32], strides = [1, 1]} : vector<2x128xf32> to vector<2x32xf32>
    %87 = vector.extract_strided_slice %84 {offsets = [0, 32], sizes = [2, 32], strides = [1, 1]} : vector<2x128xf32> to vector<2x32xf32>
    %88 = vector.extract_strided_slice %85 {offsets = [0, 64], sizes = [2, 32], strides = [1, 1]} : vector<2x128xf32> to vector<2x32xf32>
    %89 = vector.extract_strided_slice %84 {offsets = [0, 96], sizes = [2, 32], strides = [1, 1]} : vector<2x128xf32> to vector<2x32xf32>
    %90 = arith.mulf %87, %71 : vector<2x32xf32>
    %91 = arith.mulf %86, %88 : vector<2x32xf32>
    %92 = arith.addf %90, %91 : vector<2x32xf32>
    %93 = math.tanh %92 : vector<2x32xf32>
    %94 = arith.mulf %89, %93 : vector<2x32xf32>
    %95 = vector.extract_strided_slice %7 {offsets = [4, 0, 0], sizes = [1, 2, 128], strides = [1, 1, 1]} : vector<8x2x128xf32> to vector<1x2x128xf32>
    %96 = vector.shape_cast %95 : vector<1x2x128xf32> to vector<2x128xf32>
    %cst_26 = arith.constant dense<0.000000e+00> : vector<2x128xf32>
    %97 = tpu.matmul %94, %8, %cst_26 {dimension_numbers = #tpu.dot_dimension_numbers<[1], [0], [0], [1], [0, 0, 1, 1], [], []>} : vector<2x32xf32>, vector<32x128xf32>, vector<2x128xf32> -> vector<2x128xf32>
    %98 = arith.addf %96, %97 : vector<2x128xf32>
    %cst_27 = arith.constant 5.000000e-01 : f32
    %99 = vector.broadcast %cst_27 : f32 to vector<2x128xf32>
    %100 = arith.mulf %99, %98 : vector<2x128xf32>
    %101 = math.tanh %100 : vector<2x128xf32>
    %cst_28 = arith.constant 1.000000e+00 : f32
    %102 = vector.broadcast %cst_28 : f32 to vector<2x128xf32>
    %103 = arith.addf %101, %102 : vector<2x128xf32>
    %cst_29 = arith.constant 5.000000e-01 : f32
    %104 = vector.broadcast %cst_29 : f32 to vector<2x128xf32>
    %105 = arith.mulf %104, %103 : vector<2x128xf32>
    %106 = math.tanh %98 : vector<2x128xf32>
    %107 = vector.extract_strided_slice %105 {offsets = [0, 0], sizes = [2, 32], strides = [1, 1]} : vector<2x128xf32> to vector<2x32xf32>
    %108 = vector.extract_strided_slice %105 {offsets = [0, 32], sizes = [2, 32], strides = [1, 1]} : vector<2x128xf32> to vector<2x32xf32>
    %109 = vector.extract_strided_slice %106 {offsets = [0, 64], sizes = [2, 32], strides = [1, 1]} : vector<2x128xf32> to vector<2x32xf32>
    %110 = vector.extract_strided_slice %105 {offsets = [0, 96], sizes = [2, 32], strides = [1, 1]} : vector<2x128xf32> to vector<2x32xf32>
    %111 = arith.mulf %108, %92 : vector<2x32xf32>
    %112 = arith.mulf %107, %109 : vector<2x32xf32>
    %113 = arith.addf %111, %112 : vector<2x32xf32>
    %114 = math.tanh %113 : vector<2x32xf32>
    %115 = arith.mulf %110, %114 : vector<2x32xf32>
    %116 = vector.extract_strided_slice %7 {offsets = [5, 0, 0], sizes = [1, 2, 128], strides = [1, 1, 1]} : vector<8x2x128xf32> to vector<1x2x128xf32>
    %117 = vector.shape_cast %116 : vector<1x2x128xf32> to vector<2x128xf32>
    %cst_30 = arith.constant dense<0.000000e+00> : vector<2x128xf32>
    %118 = tpu.matmul %115, %8, %cst_30 {dimension_numbers = #tpu.dot_dimension_numbers<[1], [0], [0], [1], [0, 0, 1, 1], [], []>} : vector<2x32xf32>, vector<32x128xf32>, vector<2x128xf32> -> vector<2x128xf32>
    %119 = arith.addf %117, %118 : vector<2x128xf32>
    %cst_31 = arith.constant 5.000000e-01 : f32
    %120 = vector.broadcast %cst_31 : f32 to vector<2x128xf32>
    %121 = arith.mulf %120, %119 : vector<2x128xf32>
    %122 = math.tanh %121 : vector<2x128xf32>
    %cst_32 = arith.constant 1.000000e+00 : f32
    %123 = vector.broadcast %cst_32 : f32 to vector<2x128xf32>
    %124 = arith.addf %122, %123 : vector<2x128xf32>
    %cst_33 = arith.constant 5.000000e-01 : f32
    %125 = vector.broadcast %cst_33 : f32 to vector<2x128xf32>
    %126 = arith.mulf %125, %124 : vector<2x128xf32>
    %127 = math.tanh %119 : vector<2x128xf32>
    %128 = vector.extract_strided_slice %126 {offsets = [0, 0], sizes = [2, 32], strides = [1, 1]} : vector<2x128xf32> to vector<2x32xf32>
    %129 = vector.extract_strided_slice %126 {offsets = [0, 32], sizes = [2, 32], strides = [1, 1]} : vector<2x128xf32> to vector<2x32xf32>
    %130 = vector.extract_strided_slice %127 {offsets = [0, 64], sizes = [2, 32], strides = [1, 1]} : vector<2x128xf32> to vector<2x32xf32>
    %131 = vector.extract_strided_slice %126 {offsets = [0, 96], sizes = [2, 32], strides = [1, 1]} : vector<2x128xf32> to vector<2x32xf32>
    %132 = arith.mulf %129, %113 : vector<2x32xf32>
    %133 = arith.mulf %128, %130 : vector<2x32xf32>
    %134 = arith.addf %132, %133 : vector<2x32xf32>
    %135 = math.tanh %134 : vector<2x32xf32>
    %136 = arith.mulf %131, %135 : vector<2x32xf32>
    %137 = vector.extract_strided_slice %7 {offsets = [6, 0, 0], sizes = [1, 2, 128], strides = [1, 1, 1]} : vector<8x2x128xf32> to vector<1x2x128xf32>
    %138 = vector.shape_cast %137 : vector<1x2x128xf32> to vector<2x128xf32>
    %cst_34 = arith.constant dense<0.000000e+00> : vector<2x128xf32>
    %139 = tpu.matmul %136, %8, %cst_34 {dimension_numbers = #tpu.dot_dimension_numbers<[1], [0], [0], [1], [0, 0, 1, 1], [], []>} : vector<2x32xf32>, vector<32x128xf32>, vector<2x128xf32> -> vector<2x128xf32>
    %140 = arith.addf %138, %139 : vector<2x128xf32>
    %cst_35 = arith.constant 5.000000e-01 : f32
    %141 = vector.broadcast %cst_35 : f32 to vector<2x128xf32>
    %142 = arith.mulf %141, %140 : vector<2x128xf32>
    %143 = math.tanh %142 : vector<2x128xf32>
    %cst_36 = arith.constant 1.000000e+00 : f32
    %144 = vector.broadcast %cst_36 : f32 to vector<2x128xf32>
    %145 = arith.addf %143, %144 : vector<2x128xf32>
    %cst_37 = arith.constant 5.000000e-01 : f32
    %146 = vector.broadcast %cst_37 : f32 to vector<2x128xf32>
    %147 = arith.mulf %146, %145 : vector<2x128xf32>
    %148 = math.tanh %140 : vector<2x128xf32>
    %149 = vector.extract_strided_slice %147 {offsets = [0, 0], sizes = [2, 32], strides = [1, 1]} : vector<2x128xf32> to vector<2x32xf32>
    %150 = vector.extract_strided_slice %147 {offsets = [0, 32], sizes = [2, 32], strides = [1, 1]} : vector<2x128xf32> to vector<2x32xf32>
    %151 = vector.extract_strided_slice %148 {offsets = [0, 64], sizes = [2, 32], strides = [1, 1]} : vector<2x128xf32> to vector<2x32xf32>
    %152 = vector.extract_strided_slice %147 {offsets = [0, 96], sizes = [2, 32], strides = [1, 1]} : vector<2x128xf32> to vector<2x32xf32>
    %153 = arith.mulf %150, %134 : vector<2x32xf32>
    %154 = arith.mulf %149, %151 : vector<2x32xf32>
    %155 = arith.addf %153, %154 : vector<2x32xf32>
    %156 = math.tanh %155 : vector<2x32xf32>
    %157 = arith.mulf %152, %156 : vector<2x32xf32>
    %158 = vector.extract_strided_slice %7 {offsets = [7, 0, 0], sizes = [1, 2, 128], strides = [1, 1, 1]} : vector<8x2x128xf32> to vector<1x2x128xf32>
    %159 = vector.shape_cast %158 : vector<1x2x128xf32> to vector<2x128xf32>
    %cst_38 = arith.constant dense<0.000000e+00> : vector<2x128xf32>
    %160 = tpu.matmul %157, %8, %cst_38 {dimension_numbers = #tpu.dot_dimension_numbers<[1], [0], [0], [1], [0, 0, 1, 1], [], []>} : vector<2x32xf32>, vector<32x128xf32>, vector<2x128xf32> -> vector<2x128xf32>
    %161 = arith.addf %159, %160 : vector<2x128xf32>
    %cst_39 = arith.constant 5.000000e-01 : f32
    %162 = vector.broadcast %cst_39 : f32 to vector<2x128xf32>
    %163 = arith.mulf %162, %161 : vector<2x128xf32>
    %164 = math.tanh %163 : vector<2x128xf32>
    %cst_40 = arith.constant 1.000000e+00 : f32
    %165 = vector.broadcast %cst_40 : f32 to vector<2x128xf32>
    %166 = arith.addf %164, %165 : vector<2x128xf32>
    %cst_41 = arith.constant 5.000000e-01 : f32
    %167 = vector.broadcast %cst_41 : f32 to vector<2x128xf32>
    %168 = arith.mulf %167, %166 : vector<2x128xf32>
    %169 = math.tanh %161 : vector<2x128xf32>
    %170 = vector.extract_strided_slice %168 {offsets = [0, 0], sizes = [2, 32], strides = [1, 1]} : vector<2x128xf32> to vector<2x32xf32>
    %171 = vector.extract_strided_slice %168 {offsets = [0, 32], sizes = [2, 32], strides = [1, 1]} : vector<2x128xf32> to vector<2x32xf32>
    %172 = vector.extract_strided_slice %169 {offsets = [0, 64], sizes = [2, 32], strides = [1, 1]} : vector<2x128xf32> to vector<2x32xf32>
    %173 = vector.extract_strided_slice %168 {offsets = [0, 96], sizes = [2, 32], strides = [1, 1]} : vector<2x128xf32> to vector<2x32xf32>
    %174 = arith.mulf %171, %155 : vector<2x32xf32>
    %175 = arith.mulf %170, %172 : vector<2x32xf32>
    %176 = arith.addf %174, %175 : vector<2x32xf32>
    %177 = math.tanh %176 : vector<2x32xf32>
    %178 = arith.mulf %173, %177 : vector<2x32xf32>
    %179 = vector.shape_cast %31 : vector<2x32xf32> to vector<1x2x32xf32>
    %180 = vector.shape_cast %52 : vector<2x32xf32> to vector<1x2x32xf32>
    %181 = vector.shape_cast %73 : vector<2x32xf32> to vector<1x2x32xf32>
    %182 = vector.shape_cast %94 : vector<2x32xf32> to vector<1x2x32xf32>
    %183 = vector.shape_cast %115 : vector<2x32xf32> to vector<1x2x32xf32>
    %184 = vector.shape_cast %136 : vector<2x32xf32> to vector<1x2x32xf32>
    %185 = vector.shape_cast %157 : vector<2x32xf32> to vector<1x2x32xf32>
    %186 = vector.shape_cast %178 : vector<2x32xf32> to vector<1x2x32xf32>
    %187 = tpu.concatenate %179, %180, %181, %182, %183, %184, %185, %186 in 0 : vector<1x2x32xf32>, vector<1x2x32xf32>, vector<1x2x32xf32>, vector<1x2x32xf32>, vector<1x2x32xf32>, vector<1x2x32xf32>, vector<1x2x32xf32>, vector<1x2x32xf32> -> vector<8x2x32xf32>
    %c0_i32 = arith.constant 0 : i32
    %c7_i32 = arith.constant 7 : i32
    %188 = arith.addi %c0_i32, %c7_i32 : i32
    %c1_i32 = arith.constant 1 : i32
    %189 = scf.for %arg10 = %c0_i32 to %188 step %c1_i32 iter_args(%arg11 = %187) -> (vector<8x2x32xf32>)  : i32 {
      %198 = arith.index_cast %arg10 : i32 to index
      %c0_50 = arith.constant 0 : index
      %c0_51 = arith.constant 0 : index
      %199 = vector.load %arg4[%198, %c0_50, %c0_51] : memref<7x32x128xf32, #tpu.memory_space<vmem>>, vector<1x32x128xf32>
      %200 = vector.shape_cast %199 : vector<1x32x128xf32> to vector<32x128xf32>
      %201 = arith.index_cast %arg10 : i32 to index
      %c0_52 = arith.constant 0 : index
      %c0_53 = arith.constant 0 : index
      %202 = vector.load %arg5[%201, %c0_52, %c0_53] : memref<7x32x128xf32, #tpu.memory_space<vmem>>, vector<1x32x128xf32>
      %203 = vector.shape_cast %202 : vector<1x32x128xf32> to vector<32x128xf32>
      %204 = arith.index_cast %arg10 : i32 to index
      %c0_54 = arith.constant 0 : index
      %c0_55 = arith.constant 0 : index
      %205 = vector.load %arg6[%204, %c0_54, %c0_55] : memref<7x1x128xf32, #tpu.memory_space<vmem>>, vector<1x1x128xf32>
      %206 = vector.shape_cast %205 : vector<1x1x128xf32> to vector<1x128xf32>
      %207 = vector.shape_cast %arg11 : vector<8x2x32xf32> to vector<16x32xf32>
      %cst_56 = arith.constant dense<0.000000e+00> : vector<16x128xf32>
      %208 = tpu.matmul %207, %200, %cst_56 {dimension_numbers = #tpu.dot_dimension_numbers<[1], [0], [0], [1], [0, 0, 1, 1], [], []>} : vector<16x32xf32>, vector<32x128xf32>, vector<16x128xf32> -> vector<16x128xf32>
      %209 = vector.broadcast %206 : vector<1x128xf32> to vector<16x128xf32>
      %210 = arith.addf %208, %209 : vector<16x128xf32>
      %211 = vector.shape_cast %210 : vector<16x128xf32> to vector<8x2x128xf32>
      %cst_57 = arith.constant 0.000000e+00 : f32
      %212 = vector.broadcast %cst_57 : f32 to vector<2x32xf32>
      %cst_58 = arith.constant 0.000000e+00 : f32
      %213 = vector.broadcast %cst_58 : f32 to vector<2x32xf32>
      %214 = vector.extract_strided_slice %211 {offsets = [0, 0, 0], sizes = [1, 2, 128], strides = [1, 1, 1]} : vector<8x2x128xf32> to vector<1x2x128xf32>
      %215 = vector.shape_cast %214 : vector<1x2x128xf32> to vector<2x128xf32>
      %cst_59 = arith.constant dense<0.000000e+00> : vector<2x128xf32>
      %216 = tpu.matmul %212, %203, %cst_59 {dimension_numbers = #tpu.dot_dimension_numbers<[1], [0], [0], [1], [0, 0, 1, 1], [], []>} : vector<2x32xf32>, vector<32x128xf32>, vector<2x128xf32> -> vector<2x128xf32>
      %217 = arith.addf %215, %216 : vector<2x128xf32>
      %cst_60 = arith.constant 5.000000e-01 : f32
      %218 = vector.broadcast %cst_60 : f32 to vector<2x128xf32>
      %219 = arith.mulf %218, %217 : vector<2x128xf32>
      %220 = math.tanh %219 : vector<2x128xf32>
      %cst_61 = arith.constant 1.000000e+00 : f32
      %221 = vector.broadcast %cst_61 : f32 to vector<2x128xf32>
      %222 = arith.addf %220, %221 : vector<2x128xf32>
      %cst_62 = arith.constant 5.000000e-01 : f32
      %223 = vector.broadcast %cst_62 : f32 to vector<2x128xf32>
      %224 = arith.mulf %223, %222 : vector<2x128xf32>
      %225 = math.tanh %217 : vector<2x128xf32>
      %226 = vector.extract_strided_slice %224 {offsets = [0, 0], sizes = [2, 32], strides = [1, 1]} : vector<2x128xf32> to vector<2x32xf32>
      %227 = vector.extract_strided_slice %224 {offsets = [0, 32], sizes = [2, 32], strides = [1, 1]} : vector<2x128xf32> to vector<2x32xf32>
      %228 = vector.extract_strided_slice %225 {offsets = [0, 64], sizes = [2, 32], strides = [1, 1]} : vector<2x128xf32> to vector<2x32xf32>
      %229 = vector.extract_strided_slice %224 {offsets = [0, 96], sizes = [2, 32], strides = [1, 1]} : vector<2x128xf32> to vector<2x32xf32>
      %230 = arith.mulf %227, %213 : vector<2x32xf32>
      %231 = arith.mulf %226, %228 : vector<2x32xf32>
      %232 = arith.addf %230, %231 : vector<2x32xf32>
      %233 = math.tanh %232 : vector<2x32xf32>
      %234 = arith.mulf %229, %233 : vector<2x32xf32>
      %235 = vector.extract_strided_slice %211 {offsets = [1, 0, 0], sizes = [1, 2, 128], strides = [1, 1, 1]} : vector<8x2x128xf32> to vector<1x2x128xf32>
      %236 = vector.shape_cast %235 : vector<1x2x128xf32> to vector<2x128xf32>
      %cst_63 = arith.constant dense<0.000000e+00> : vector<2x128xf32>
      %237 = tpu.matmul %234, %203, %cst_63 {dimension_numbers = #tpu.dot_dimension_numbers<[1], [0], [0], [1], [0, 0, 1, 1], [], []>} : vector<2x32xf32>, vector<32x128xf32>, vector<2x128xf32> -> vector<2x128xf32>
      %238 = arith.addf %236, %237 : vector<2x128xf32>
      %cst_64 = arith.constant 5.000000e-01 : f32
      %239 = vector.broadcast %cst_64 : f32 to vector<2x128xf32>
      %240 = arith.mulf %239, %238 : vector<2x128xf32>
      %241 = math.tanh %240 : vector<2x128xf32>
      %cst_65 = arith.constant 1.000000e+00 : f32
      %242 = vector.broadcast %cst_65 : f32 to vector<2x128xf32>
      %243 = arith.addf %241, %242 : vector<2x128xf32>
      %cst_66 = arith.constant 5.000000e-01 : f32
      %244 = vector.broadcast %cst_66 : f32 to vector<2x128xf32>
      %245 = arith.mulf %244, %243 : vector<2x128xf32>
      %246 = math.tanh %238 : vector<2x128xf32>
      %247 = vector.extract_strided_slice %245 {offsets = [0, 0], sizes = [2, 32], strides = [1, 1]} : vector<2x128xf32> to vector<2x32xf32>
      %248 = vector.extract_strided_slice %245 {offsets = [0, 32], sizes = [2, 32], strides = [1, 1]} : vector<2x128xf32> to vector<2x32xf32>
      %249 = vector.extract_strided_slice %246 {offsets = [0, 64], sizes = [2, 32], strides = [1, 1]} : vector<2x128xf32> to vector<2x32xf32>
      %250 = vector.extract_strided_slice %245 {offsets = [0, 96], sizes = [2, 32], strides = [1, 1]} : vector<2x128xf32> to vector<2x32xf32>
      %251 = arith.mulf %248, %232 : vector<2x32xf32>
      %252 = arith.mulf %247, %249 : vector<2x32xf32>
      %253 = arith.addf %251, %252 : vector<2x32xf32>
      %254 = math.tanh %253 : vector<2x32xf32>
      %255 = arith.mulf %250, %254 : vector<2x32xf32>
      %256 = vector.extract_strided_slice %211 {offsets = [2, 0, 0], sizes = [1, 2, 128], strides = [1, 1, 1]} : vector<8x2x128xf32> to vector<1x2x128xf32>
      %257 = vector.shape_cast %256 : vector<1x2x128xf32> to vector<2x128xf32>
      %cst_67 = arith.constant dense<0.000000e+00> : vector<2x128xf32>
      %258 = tpu.matmul %255, %203, %cst_67 {dimension_numbers = #tpu.dot_dimension_numbers<[1], [0], [0], [1], [0, 0, 1, 1], [], []>} : vector<2x32xf32>, vector<32x128xf32>, vector<2x128xf32> -> vector<2x128xf32>
      %259 = arith.addf %257, %258 : vector<2x128xf32>
      %cst_68 = arith.constant 5.000000e-01 : f32
      %260 = vector.broadcast %cst_68 : f32 to vector<2x128xf32>
      %261 = arith.mulf %260, %259 : vector<2x128xf32>
      %262 = math.tanh %261 : vector<2x128xf32>
      %cst_69 = arith.constant 1.000000e+00 : f32
      %263 = vector.broadcast %cst_69 : f32 to vector<2x128xf32>
      %264 = arith.addf %262, %263 : vector<2x128xf32>
      %cst_70 = arith.constant 5.000000e-01 : f32
      %265 = vector.broadcast %cst_70 : f32 to vector<2x128xf32>
      %266 = arith.mulf %265, %264 : vector<2x128xf32>
      %267 = math.tanh %259 : vector<2x128xf32>
      %268 = vector.extract_strided_slice %266 {offsets = [0, 0], sizes = [2, 32], strides = [1, 1]} : vector<2x128xf32> to vector<2x32xf32>
      %269 = vector.extract_strided_slice %266 {offsets = [0, 32], sizes = [2, 32], strides = [1, 1]} : vector<2x128xf32> to vector<2x32xf32>
      %270 = vector.extract_strided_slice %267 {offsets = [0, 64], sizes = [2, 32], strides = [1, 1]} : vector<2x128xf32> to vector<2x32xf32>
      %271 = vector.extract_strided_slice %266 {offsets = [0, 96], sizes = [2, 32], strides = [1, 1]} : vector<2x128xf32> to vector<2x32xf32>
      %272 = arith.mulf %269, %253 : vector<2x32xf32>
      %273 = arith.mulf %268, %270 : vector<2x32xf32>
      %274 = arith.addf %272, %273 : vector<2x32xf32>
      %275 = math.tanh %274 : vector<2x32xf32>
      %276 = arith.mulf %271, %275 : vector<2x32xf32>
      %277 = vector.extract_strided_slice %211 {offsets = [3, 0, 0], sizes = [1, 2, 128], strides = [1, 1, 1]} : vector<8x2x128xf32> to vector<1x2x128xf32>
      %278 = vector.shape_cast %277 : vector<1x2x128xf32> to vector<2x128xf32>
      %cst_71 = arith.constant dense<0.000000e+00> : vector<2x128xf32>
      %279 = tpu.matmul %276, %203, %cst_71 {dimension_numbers = #tpu.dot_dimension_numbers<[1], [0], [0], [1], [0, 0, 1, 1], [], []>} : vector<2x32xf32>, vector<32x128xf32>, vector<2x128xf32> -> vector<2x128xf32>
      %280 = arith.addf %278, %279 : vector<2x128xf32>
      %cst_72 = arith.constant 5.000000e-01 : f32
      %281 = vector.broadcast %cst_72 : f32 to vector<2x128xf32>
      %282 = arith.mulf %281, %280 : vector<2x128xf32>
      %283 = math.tanh %282 : vector<2x128xf32>
      %cst_73 = arith.constant 1.000000e+00 : f32
      %284 = vector.broadcast %cst_73 : f32 to vector<2x128xf32>
      %285 = arith.addf %283, %284 : vector<2x128xf32>
      %cst_74 = arith.constant 5.000000e-01 : f32
      %286 = vector.broadcast %cst_74 : f32 to vector<2x128xf32>
      %287 = arith.mulf %286, %285 : vector<2x128xf32>
      %288 = math.tanh %280 : vector<2x128xf32>
      %289 = vector.extract_strided_slice %287 {offsets = [0, 0], sizes = [2, 32], strides = [1, 1]} : vector<2x128xf32> to vector<2x32xf32>
      %290 = vector.extract_strided_slice %287 {offsets = [0, 32], sizes = [2, 32], strides = [1, 1]} : vector<2x128xf32> to vector<2x32xf32>
      %291 = vector.extract_strided_slice %288 {offsets = [0, 64], sizes = [2, 32], strides = [1, 1]} : vector<2x128xf32> to vector<2x32xf32>
      %292 = vector.extract_strided_slice %287 {offsets = [0, 96], sizes = [2, 32], strides = [1, 1]} : vector<2x128xf32> to vector<2x32xf32>
      %293 = arith.mulf %290, %274 : vector<2x32xf32>
      %294 = arith.mulf %289, %291 : vector<2x32xf32>
      %295 = arith.addf %293, %294 : vector<2x32xf32>
      %296 = math.tanh %295 : vector<2x32xf32>
      %297 = arith.mulf %292, %296 : vector<2x32xf32>
      %298 = vector.extract_strided_slice %211 {offsets = [4, 0, 0], sizes = [1, 2, 128], strides = [1, 1, 1]} : vector<8x2x128xf32> to vector<1x2x128xf32>
      %299 = vector.shape_cast %298 : vector<1x2x128xf32> to vector<2x128xf32>
      %cst_75 = arith.constant dense<0.000000e+00> : vector<2x128xf32>
      %300 = tpu.matmul %297, %203, %cst_75 {dimension_numbers = #tpu.dot_dimension_numbers<[1], [0], [0], [1], [0, 0, 1, 1], [], []>} : vector<2x32xf32>, vector<32x128xf32>, vector<2x128xf32> -> vector<2x128xf32>
      %301 = arith.addf %299, %300 : vector<2x128xf32>
      %cst_76 = arith.constant 5.000000e-01 : f32
      %302 = vector.broadcast %cst_76 : f32 to vector<2x128xf32>
      %303 = arith.mulf %302, %301 : vector<2x128xf32>
      %304 = math.tanh %303 : vector<2x128xf32>
      %cst_77 = arith.constant 1.000000e+00 : f32
      %305 = vector.broadcast %cst_77 : f32 to vector<2x128xf32>
      %306 = arith.addf %304, %305 : vector<2x128xf32>
      %cst_78 = arith.constant 5.000000e-01 : f32
      %307 = vector.broadcast %cst_78 : f32 to vector<2x128xf32>
      %308 = arith.mulf %307, %306 : vector<2x128xf32>
      %309 = math.tanh %301 : vector<2x128xf32>
      %310 = vector.extract_strided_slice %308 {offsets = [0, 0], sizes = [2, 32], strides = [1, 1]} : vector<2x128xf32> to vector<2x32xf32>
      %311 = vector.extract_strided_slice %308 {offsets = [0, 32], sizes = [2, 32], strides = [1, 1]} : vector<2x128xf32> to vector<2x32xf32>
      %312 = vector.extract_strided_slice %309 {offsets = [0, 64], sizes = [2, 32], strides = [1, 1]} : vector<2x128xf32> to vector<2x32xf32>
      %313 = vector.extract_strided_slice %308 {offsets = [0, 96], sizes = [2, 32], strides = [1, 1]} : vector<2x128xf32> to vector<2x32xf32>
      %314 = arith.mulf %311, %295 : vector<2x32xf32>
      %315 = arith.mulf %310, %312 : vector<2x32xf32>
      %316 = arith.addf %314, %315 : vector<2x32xf32>
      %317 = math.tanh %316 : vector<2x32xf32>
      %318 = arith.mulf %313, %317 : vector<2x32xf32>
      %319 = vector.extract_strided_slice %211 {offsets = [5, 0, 0], sizes = [1, 2, 128], strides = [1, 1, 1]} : vector<8x2x128xf32> to vector<1x2x128xf32>
      %320 = vector.shape_cast %319 : vector<1x2x128xf32> to vector<2x128xf32>
      %cst_79 = arith.constant dense<0.000000e+00> : vector<2x128xf32>
      %321 = tpu.matmul %318, %203, %cst_79 {dimension_numbers = #tpu.dot_dimension_numbers<[1], [0], [0], [1], [0, 0, 1, 1], [], []>} : vector<2x32xf32>, vector<32x128xf32>, vector<2x128xf32> -> vector<2x128xf32>
      %322 = arith.addf %320, %321 : vector<2x128xf32>
      %cst_80 = arith.constant 5.000000e-01 : f32
      %323 = vector.broadcast %cst_80 : f32 to vector<2x128xf32>
      %324 = arith.mulf %323, %322 : vector<2x128xf32>
      %325 = math.tanh %324 : vector<2x128xf32>
      %cst_81 = arith.constant 1.000000e+00 : f32
      %326 = vector.broadcast %cst_81 : f32 to vector<2x128xf32>
      %327 = arith.addf %325, %326 : vector<2x128xf32>
      %cst_82 = arith.constant 5.000000e-01 : f32
      %328 = vector.broadcast %cst_82 : f32 to vector<2x128xf32>
      %329 = arith.mulf %328, %327 : vector<2x128xf32>
      %330 = math.tanh %322 : vector<2x128xf32>
      %331 = vector.extract_strided_slice %329 {offsets = [0, 0], sizes = [2, 32], strides = [1, 1]} : vector<2x128xf32> to vector<2x32xf32>
      %332 = vector.extract_strided_slice %329 {offsets = [0, 32], sizes = [2, 32], strides = [1, 1]} : vector<2x128xf32> to vector<2x32xf32>
      %333 = vector.extract_strided_slice %330 {offsets = [0, 64], sizes = [2, 32], strides = [1, 1]} : vector<2x128xf32> to vector<2x32xf32>
      %334 = vector.extract_strided_slice %329 {offsets = [0, 96], sizes = [2, 32], strides = [1, 1]} : vector<2x128xf32> to vector<2x32xf32>
      %335 = arith.mulf %332, %316 : vector<2x32xf32>
      %336 = arith.mulf %331, %333 : vector<2x32xf32>
      %337 = arith.addf %335, %336 : vector<2x32xf32>
      %338 = math.tanh %337 : vector<2x32xf32>
      %339 = arith.mulf %334, %338 : vector<2x32xf32>
      %340 = vector.extract_strided_slice %211 {offsets = [6, 0, 0], sizes = [1, 2, 128], strides = [1, 1, 1]} : vector<8x2x128xf32> to vector<1x2x128xf32>
      %341 = vector.shape_cast %340 : vector<1x2x128xf32> to vector<2x128xf32>
      %cst_83 = arith.constant dense<0.000000e+00> : vector<2x128xf32>
      %342 = tpu.matmul %339, %203, %cst_83 {dimension_numbers = #tpu.dot_dimension_numbers<[1], [0], [0], [1], [0, 0, 1, 1], [], []>} : vector<2x32xf32>, vector<32x128xf32>, vector<2x128xf32> -> vector<2x128xf32>
      %343 = arith.addf %341, %342 : vector<2x128xf32>
      %cst_84 = arith.constant 5.000000e-01 : f32
      %344 = vector.broadcast %cst_84 : f32 to vector<2x128xf32>
      %345 = arith.mulf %344, %343 : vector<2x128xf32>
      %346 = math.tanh %345 : vector<2x128xf32>
      %cst_85 = arith.constant 1.000000e+00 : f32
      %347 = vector.broadcast %cst_85 : f32 to vector<2x128xf32>
      %348 = arith.addf %346, %347 : vector<2x128xf32>
      %cst_86 = arith.constant 5.000000e-01 : f32
      %349 = vector.broadcast %cst_86 : f32 to vector<2x128xf32>
      %350 = arith.mulf %349, %348 : vector<2x128xf32>
      %351 = math.tanh %343 : vector<2x128xf32>
      %352 = vector.extract_strided_slice %350 {offsets = [0, 0], sizes = [2, 32], strides = [1, 1]} : vector<2x128xf32> to vector<2x32xf32>
      %353 = vector.extract_strided_slice %350 {offsets = [0, 32], sizes = [2, 32], strides = [1, 1]} : vector<2x128xf32> to vector<2x32xf32>
      %354 = vector.extract_strided_slice %351 {offsets = [0, 64], sizes = [2, 32], strides = [1, 1]} : vector<2x128xf32> to vector<2x32xf32>
      %355 = vector.extract_strided_slice %350 {offsets = [0, 96], sizes = [2, 32], strides = [1, 1]} : vector<2x128xf32> to vector<2x32xf32>
      %356 = arith.mulf %353, %337 : vector<2x32xf32>
      %357 = arith.mulf %352, %354 : vector<2x32xf32>
      %358 = arith.addf %356, %357 : vector<2x32xf32>
      %359 = math.tanh %358 : vector<2x32xf32>
      %360 = arith.mulf %355, %359 : vector<2x32xf32>
      %361 = vector.extract_strided_slice %211 {offsets = [7, 0, 0], sizes = [1, 2, 128], strides = [1, 1, 1]} : vector<8x2x128xf32> to vector<1x2x128xf32>
      %362 = vector.shape_cast %361 : vector<1x2x128xf32> to vector<2x128xf32>
      %cst_87 = arith.constant dense<0.000000e+00> : vector<2x128xf32>
      %363 = tpu.matmul %360, %203, %cst_87 {dimension_numbers = #tpu.dot_dimension_numbers<[1], [0], [0], [1], [0, 0, 1, 1], [], []>} : vector<2x32xf32>, vector<32x128xf32>, vector<2x128xf32> -> vector<2x128xf32>
      %364 = arith.addf %362, %363 : vector<2x128xf32>
      %cst_88 = arith.constant 5.000000e-01 : f32
      %365 = vector.broadcast %cst_88 : f32 to vector<2x128xf32>
      %366 = arith.mulf %365, %364 : vector<2x128xf32>
      %367 = math.tanh %366 : vector<2x128xf32>
      %cst_89 = arith.constant 1.000000e+00 : f32
      %368 = vector.broadcast %cst_89 : f32 to vector<2x128xf32>
      %369 = arith.addf %367, %368 : vector<2x128xf32>
      %cst_90 = arith.constant 5.000000e-01 : f32
      %370 = vector.broadcast %cst_90 : f32 to vector<2x128xf32>
      %371 = arith.mulf %370, %369 : vector<2x128xf32>
      %372 = math.tanh %364 : vector<2x128xf32>
      %373 = vector.extract_strided_slice %371 {offsets = [0, 0], sizes = [2, 32], strides = [1, 1]} : vector<2x128xf32> to vector<2x32xf32>
      %374 = vector.extract_strided_slice %371 {offsets = [0, 32], sizes = [2, 32], strides = [1, 1]} : vector<2x128xf32> to vector<2x32xf32>
      %375 = vector.extract_strided_slice %372 {offsets = [0, 64], sizes = [2, 32], strides = [1, 1]} : vector<2x128xf32> to vector<2x32xf32>
      %376 = vector.extract_strided_slice %371 {offsets = [0, 96], sizes = [2, 32], strides = [1, 1]} : vector<2x128xf32> to vector<2x32xf32>
      %377 = arith.mulf %374, %358 : vector<2x32xf32>
      %378 = arith.mulf %373, %375 : vector<2x32xf32>
      %379 = arith.addf %377, %378 : vector<2x32xf32>
      %380 = math.tanh %379 : vector<2x32xf32>
      %381 = arith.mulf %376, %380 : vector<2x32xf32>
      %382 = vector.shape_cast %234 : vector<2x32xf32> to vector<1x2x32xf32>
      %383 = vector.shape_cast %255 : vector<2x32xf32> to vector<1x2x32xf32>
      %384 = vector.shape_cast %276 : vector<2x32xf32> to vector<1x2x32xf32>
      %385 = vector.shape_cast %297 : vector<2x32xf32> to vector<1x2x32xf32>
      %386 = vector.shape_cast %318 : vector<2x32xf32> to vector<1x2x32xf32>
      %387 = vector.shape_cast %339 : vector<2x32xf32> to vector<1x2x32xf32>
      %388 = vector.shape_cast %360 : vector<2x32xf32> to vector<1x2x32xf32>
      %389 = vector.shape_cast %381 : vector<2x32xf32> to vector<1x2x32xf32>
      %390 = tpu.concatenate %382, %383, %384, %385, %386, %387, %388, %389 in 0 : vector<1x2x32xf32>, vector<1x2x32xf32>, vector<1x2x32xf32>, vector<1x2x32xf32>, vector<1x2x32xf32>, vector<1x2x32xf32>, vector<1x2x32xf32>, vector<1x2x32xf32> -> vector<8x2x32xf32>
      scf.yield %390 : vector<8x2x32xf32>
    }
    %c7_i32_42 = arith.constant 7 : i32
    %190 = vector.extract_strided_slice %189 {offsets = [7, 0, 0], sizes = [1, 2, 32], strides = [1, 1, 1]} : vector<8x2x32xf32> to vector<1x2x32xf32>
    %191 = vector.shape_cast %190 : vector<1x2x32xf32> to vector<2x32xf32>
    %c0_43 = arith.constant 0 : index
    %c0_44 = arith.constant 0 : index
    %192 = vector.load %arg7[%c0_43, %c0_44] : memref<32x8xf32, #tpu.memory_space<vmem>>, vector<32x8xf32>
    %cst_45 = arith.constant dense<0.000000e+00> : vector<2x8xf32>
    %193 = tpu.matmul %191, %192, %cst_45 {dimension_numbers = #tpu.dot_dimension_numbers<[1], [0], [0], [1], [0, 0, 1, 1], [], []>} : vector<2x32xf32>, vector<32x8xf32>, vector<2x8xf32> -> vector<2x8xf32>
    %c0_46 = arith.constant 0 : index
    %c0_47 = arith.constant 0 : index
    %194 = vector.load %arg8[%c0_46, %c0_47] : memref<1x8xf32, #tpu.memory_space<vmem>>, vector<1x8xf32>
    %195 = vector.broadcast %194 : vector<1x8xf32> to vector<2x8xf32>
    %196 = arith.addf %193, %195 : vector<2x8xf32>
    %c0_48 = arith.constant 0 : index
    %c0_49 = arith.constant 0 : index
    %197 = vector.load %arg9[%c0_48, %c0_49] : memref<2x8xf32, #tpu.memory_space<vmem>>, vector<2x8xf32>
    tpu.vector_store %arg9[%c0_48, %c0_49], %196 {strides = array<i32>} : memref<2x8xf32, #tpu.memory_space<vmem>>, vector<2x8xf32>,
    return
  }
}

</mosaic_0001>

<bundles_post_ra>
// kernel: tpu_custom_call.1
= control target key start
LH: loop header
LB: loop body
LE: loop exit
PB: predicated region body
PF: predicated region fallthrough
CT: control target
= control target key end

     0   :  { %14 = vsyncpa [#allocation3], 0  ;;  %s3612_s0 = inlined_call_operand.hbm [shape: f32[8,2,16], index: 0, kind: input, shape index: {}]   ;;  %s3613_s1 = inlined_call_operand.hbm [shape: f32[16,128], index: 1, kind: input, shape index: {}]   ;;  %s3614_s2 = inlined_call_operand.vmem [shape: f32[32,128], index: 2, kind: input, shape index: {}]   ;;  %s3615_s3 = inlined_call_operand.vmem [shape: f32[1,128], index: 3, kind: input, shape index: {}]   ;;  %s3616_s4 = inlined_call_operand.hbm [shape: f32[7,32,128], index: 4, kind: input, shape index: {}]   ;;  %s3617_s5 = inlined_call_operand.hbm [shape: f32[7,32,128], index: 5, kind: input, shape index: {}]   ;;  %s3618_s6 = inlined_call_operand.vmem [shape: f32[7,1,128], index: 6, kind: input, shape index: {}]   ;;  %s3619_s7 = inlined_call_operand.vmem [shape: f32[32,8], index: 7, kind: input, shape index: {}]   ;;  %s3620_s8 = inlined_call_operand.vmem [shape: f32[1,8], index: 8, kind: input, shape index: {}]   ;;  %s3621_s9 = inlined_call_operand.hbm [shape: f32[2,8], index: 9, kind: output, shape index: {}]  }
   0x1   :  { %15 = vsyncpa [#allocation6], 0 }
   0x2   :  { %16 = vsyncpa [#allocation9], 0 }
   0x3   :  { %17 = vsyncpa [#allocation4], 0  ;;  %s3097_s30 = smov [#allocation5]   ;;  %s2907_s13 = scalar_lea.hbm %s3613_s1, 256 }
   0x4   :  { %s35_s10 = sshll.u32 %s3097_s30, 4  ;;  %p2908_p0 = scmp.ne.s32.totalorder %s3613_s1, %s2907_s13  ;;  %s36_s10 = int_to_ptr.vmem [resolvable:$true] %s35_s10 }
   0x5   :  { %p2911_p1 = scmp.lt.u32.totalorder %s2907_s13, %s3613_s1 }
   0x7   :  { %p2913_p2 = pnand %p2911_p1, %p2908_p0 }
   0x9   :  { %2916 = shalt.err (!%p2913_p2)
}
   0xa   :  { %s2917_s18 = scalar_lea.vmem %s36_s10, 256  ;;  %p2922_p4 = scmp.lt.s32.totalorder %s36_s10, %s36_s10 }
   0xb   :  { %p2918_p3 = scmp.ne.s32.totalorder %s36_s10, %s2917_s18  ;;  %p2923_p5 = scmp.lt.s32.totalorder %s2917_s18, %s2917_s18 }
   0xd   :  { %p2924_p6 = por %p2923_p5, %p2922_p4 }
   0xf   :  { %p2925_p7 = pnand %p2924_p6, %p2918_p3 }
  0x11   :  { %2928 = shalt.err (!%p2925_p7)
}
  0x12   :  { %s3098_s19 = smov 128   ;;  %s3099_s20 = smov 8  }
  0x13   :  { %41 = dma.hbm_to_vmem [thread:$0]  %s3613_s1, 256, %s36_s10, [#allocation6], %s3098_s19, %s3098_s19, %s3099_s20  }
  0x14   :  { %s3100_s23 = smov [#allocation2]   ;;  %s2929_s27 = scalar_lea.hbm %s3612_s0, 256 }
  0x15   :  { %s23_s24 = sshll.u32 %s3100_s23, 4  ;;  %p2930_p8 = scmp.ne.s32.totalorder %s3612_s0, %s2929_s27  ;;  %s24_s24 = int_to_ptr.vmem [resolvable:$true] %s23_s24 }
  0x16   :  { %p2933_p9 = scmp.lt.u32.totalorder %s2929_s27, %s3612_s0 }
  0x18   :  { %p2935_p10 = pnand %p2933_p9, %p2930_p8 }
  0x1a   :  { %2938 = shalt.err (!%p2935_p10)
}
  0x1b   :  { %s2939_s12 = scalar_lea.vmem %s24_s24, 256  ;;  %p2944_p12 = scmp.lt.s32.totalorder %s24_s24, %s24_s24 }
  0x1c   :  { %p2940_p11 = scmp.ne.s32.totalorder %s24_s24, %s2939_s12  ;;  %p2945_p13 = scmp.lt.s32.totalorder %s2939_s12, %s2939_s12 }
  0x1e   :  { %p2946_p0 = por %p2945_p13, %p2944_p12 }
  0x20   :  { %p2947_p1 = pnand %p2946_p0, %p2940_p11 }
  0x22   :  { %2950 = shalt.err (!%p2947_p1)
}
  0x23   :  { %s3101_s1 = smov 32   ;;  %s3102_s10 = smov 2  }
  0x24   :  { %29 = dma.hbm_to_vmem [thread:$0]  %s3612_s0, 256, %s24_s24, [#allocation3], %s3101_s1, %s3101_s1, %s3102_s10  }
  0x25   :  { %s3103_s15 = smov [#allocation7]   ;;  %s3104_s17 = smov [#allocation8]  }
  0x26   :  { %s51_s16 = sshll.u32 %s3103_s15, 4  ;;  %s63_s18 = sshll.u32 %s3104_s17, 4  ;;  %s52_s16 = int_to_ptr.vmem [resolvable:$true] %s51_s16  ;;  %s3195_s18 = int_to_ptr.vmem [resolvable:$true] %s63_s18 }
  0x27   :  { %s2951_s23 = scalar_lea.hbm %s3616_s4, 3584 }
  0x28   :  { %p2952_p2 = scmp.ne.s32.totalorder %s3616_s4, %s2951_s23  ;;  %p2955_p3 = scmp.lt.u32.totalorder %s2951_s23, %s3616_s4 }
  0x2a   :  { %p2957_p4 = pnand %p2955_p3, %p2952_p2 }
  0x2c   :  { %2960 = shalt.err (!%p2957_p4)
}
  0x2d   :  { %s2961_s0 = scalar_lea.vmem %s52_s16, 3584  ;;  %p2966_p6 = scmp.lt.s32.totalorder %s52_s16, %s52_s16 }
  0x2e   :  { %p2962_p5 = scmp.ne.s32.totalorder %s52_s16, %s2961_s0  ;;  %p2967_p7 = scmp.lt.s32.totalorder %s2961_s0, %s2961_s0 }
  0x30   :  { %p2968_p8 = por %p2967_p7, %p2966_p6 }
  0x32   :  { %p2969_p9 = pnand %p2968_p8, %p2962_p5 }
  0x34   :  { %2972 = shalt.err (!%p2969_p9)
}
  0x35   :  { %57 = dma.hbm_to_vmem [thread:$0]  %s3616_s4, 3584, %s52_s16, [#allocation6], %s3098_s19, %s3098_s19, %s3099_s20  }
  0x36   :  { %s2973_s12 = scalar_lea.hbm %s3617_s5, 3584 }
  0x37   :  { %p2974_p10 = scmp.ne.s32.totalorder %s3617_s5, %s2973_s12  ;;  %p2977_p11 = scmp.lt.u32.totalorder %s2973_s12, %s3617_s5 }
  0x39   :  { %p2979_p12 = pnand %p2977_p11, %p2974_p10 }
  0x3b   :  { %2982 = shalt.err (!%p2979_p12)
}
  0x3c   :  { %s2983_s17 = scalar_lea.vmem %s3195_s18, 3584  ;;  %p2988_p0 = scmp.lt.s32.totalorder %s3195_s18, %s3195_s18 }
  0x3d   :  { %p2984_p13 = scmp.ne.s32.totalorder %s3195_s18, %s2983_s17  ;;  %p2989_p1 = scmp.lt.s32.totalorder %s2983_s17, %s2983_s17 }
  0x3f   :  { %p2990_p2 = por %p2989_p1, %p2988_p0 }
  0x41   :  { %p2991_p3 = pnand %p2990_p2, %p2984_p13 }
  0x43   :  { %2994 = shalt.err (!%p2991_p3)
}
  0x44   :  { %69 = dma.hbm_to_vmem [thread:$0]  %s3617_s5, 3584, %s3195_s18, [#allocation9], %s3098_s19, %s3098_s19, %s3099_s20  }
  0x45   :  { %3053 = dma.done.wait [#allocation3], 256  }
  0x46   :  { %3054 = vsyncadd [#allocation3], 4294967040 }
  0x47   :  { %3055 = dma.done.wait [#allocation6], 3840  }
  0x48   :  { %3056 = vsyncadd [#allocation6], 4294963456 }
  0x49   :  { %3057 = dma.done.wait [#allocation9], 3584  }
  0x4a   :  { %3058 = vsyncadd [#allocation9], 4294963712  ;;  %v118_v0 = vlaneseq  ;;  %v3105_v1 = vmov 0.0|0.0   ;;  %v3106_v2 = vmov 1983009808   ;;  %vm3107_vm0 = vmmov 0  }
  0x4b   :  { %2610 = vmatprep.subr.bf16.mxu1 %v3105_v1  ;;  %v116_v3 = vunpack.c.l.s4 %v3106_v2  ;;  %v3108_v4 = vmov 0.0   ;;  %v96_v7 = vld [vmem:[#allocation5] sm:$0xff]  ;;  %v97_v8 = vld [vmem:[#allocation5 + $0x8] sm:$0xff]  ;;  %v271_v9 = vld [vmem:[%s3614_s2] sm:$0xff]  ;;  %vm147_vm1 = vcmask 130048   ;;  %s3109_s27 = smov 64  }
  0x4c   :  { %2416 = vmatprep.mubr.msk.f32.mxu1 %vm3107_vm0, %v3108_v4  ;;  %v119_v6 = vshrl.u32 %v118_v0, 7  ;;  %v2606_v11 = vpack.c.bf16 %v97_v8, %v96_v7  ;;  %v272_v12 = vld [vmem:[%s3614_s2 + $0x8] sm:$0xff]  ;;  %v88_v13 = vld [vmem:[#allocation2] sm:$0x3]  ;;  %v89_v14 = vld [vmem:[#allocation2 + $0x2] sm:$0x3] }
  0x4d   :  { %v117_v5 = vunpack.c.0.s8 %v116_v3  ;;  %v3243_v15 = vpack.c.bf16 %v272_v12, %v271_v9  ;;  %v90_v16 = vld [vmem:[#allocation2 + $0x4] sm:$0x3]  ;;  %v91_v17 = vld [vmem:[#allocation2 + $0x6] sm:$0x3]  ;;  %v113_v18 = vcombine.low %v88_v13, %v89_v14  ;;  %v92_v19 = vld [vmem:[#allocation2 + $0x8] sm:$0x3] }
  0x4e   :  { %2607 = vmatprep.subr.bf16.mxu0 %v2606_v11  ;;  %v114_v20 = vcombine.low %v90_v16, %v91_v17  ;;  %v93_v21 = vld [vmem:[#allocation2 + $0xa] sm:$0x3]  ;;  %v94_v22 = vld [vmem:[#allocation2 + $0xc] sm:$0x3]  ;;  %v95_v23 = vld [vmem:[#allocation2 + $0xe] sm:$0x3] }
  0x4f   :  { %v3238_v10 = vsub.s32 %v117_v5, %v119_v6  ;;  %2609 = vmatpush3.bf16.msra.mxu0 %v2606_v11  ;;  %2612 = vmatpush3.bf16.msra.mxu1 %v3243_v15  ;;  %v130_v25 = vcombine.low %v92_v19, %v93_v21  ;;  %v131_v26 = vcombine.low %v94_v22, %v95_v23  ;;  %v273_v27 = vld [vmem:[%s3614_s2 + $0x10] sm:$0xff]  ;;  %v274_v28 = vld [vmem:[%s3614_s2 + $0x18] sm:$0xff]  ;;  %v2283_v35 = vld [vmem:[%s3615_s3] ss:$0 sm:$0xff]  ;;  %vm275_vm2 = vcmask 261120   ;;  %s3401_s3 = smov 0  }
  0x50   :  { %2613 = vmatprep.subr.bf16.mxu1 %v3105_v1  ;;  %v3255_v30 = vpack.c.bf16 %v274_v28, %v273_v27  ;;  %2616 = vmatprep.subr.bf16.mxu0 %v3105_v1 }
  0x51   :  { %v121_v24 = vrot.slane %v113_v18, %v3238_v10  ;;  %v128_v29 = vrot.slane %v114_v20, %v3238_v10  ;;  %v138_v31 = vrot.slane %v130_v25, %v3238_v10  ;;  %v145_v32 = vrot.slane %v131_v26, %v3238_v10 }
  0x53   :  { %v129_v33 = vcombine.low %v121_v24, %v128_v29  ;;  %v146_v34 = vcombine.low %v138_v31, %v145_v32  ;;  %2615 = vmatpush3.bf16.msra.mxu1 %v3255_v30 }
  0x54   :  { %2622 = vmatprep.subr.bf16.mxu1 %v3105_v1 }
  0x55   :  { %2405 = vmatprep.mubr.msk.f32.mxu0 %vm147_vm1, %v129_v33 }
  0x56   :  { %2406 = vmatmul.mubr.msk.f32.vlgmr.msra.gmra.mrb[0].mxu0 %vm147_vm1, %v146_v34  ;;  %2417 = vmatmul.mubr.f32.vlgmr.msra.gmra.mrb[0].mxu1 %v3108_v4 }
  0x57   :  { %2618 = vmatpush3.bf16.msra.mxu0 %v3243_v15  ;;  %2427 = vmatprep.mubr.msk.f32.mxu0 %vm3107_vm0, %v3108_v4 }
  0x58   :  { %2619 = vmatprep.subr.bf16.mxu0 %v3105_v1  ;;  %2624 = vmatpush3.bf16.msra.mxu1 %v3243_v15 }
  0x59   :  { %2438 = vmatprep.mubr.msk.f32.mxu1 %vm3107_vm0, %v3108_v4  ;;  %2625 = vmatprep.subr.bf16.mxu1 %v3105_v1 }
  0x5b   :  { %2621 = vmatpush3.bf16.msra.mxu0 %v3255_v30 }
  0x5c   :  { %2628 = vmatprep.subr.bf16.mxu0 %v3105_v1  ;;  %2627 = vmatpush3.bf16.msra.mxu1 %v3255_v30 }
  0x5d   :  { %2634 = vmatprep.subr.bf16.mxu1 %v3105_v1 }
 0x129   :  { %v2407_v36 = vpop.f32.mrb[0].mxu0  ;;  %v345_v39 = vpop.f32.mrb[0].mxu1 }
 0x12a   :  { %v3278_v37 = vadd.f32 %v2407_v36, %v2283_v35  ;;  %v218_v38 = vpop.f32.mrb[1].mxu0  ;;  %v2418_v41 = vpop.f32.mrb[1].mxu1 }
 0x12b   :  { %v3280_v40 = vadd.f32 %v2283_v35, %v218_v38 }
 0x12d   :  { %v236_v42 = vrot.slane %v3280_v40, %v3238_v10  ;;  %v229_v18 = vcombine.high %v3280_v40, %v3280_v40 }
 0x12f   :  { %v349_v43 = vadd.f32 %v345_v39, %v236_v42  ;;  %v244_v59 = vcombine.high %v236_v42, %v236_v42  ;;  %v243_v19 = vrot.slane %v229_v18, %v3238_v10 }
 0x131   :  { %2811 = vtanh.f32 %v349_v43  ;;  %v350_v45 = vmul.f32 0.5, %v349_v43  ;;  %v245_v40 = vcombine.high %v243_v19, %v243_v19 }
 0x133   :  { %2813 = vtanh.f32 %v350_v45 }
 0x13b   :  { %v2812_v44 = vpop.eup %2811 }
 0x13c   :  { %357 = vrot.lane.b32.xlu0 %v2812_v44, %s3109_s27 }
 0x13d   :  { %v2814_v46 = vpop.eup %2813 }
 0x13e   :  { %v352_v47 = vadd.f32 1.0, %v2814_v46 }
 0x140   :  { %v353_v48 = vmul.f32 0.5, %v352_v47 }
 0x142   :  { %v355_v51 = vmul.f32 0.0, %v353_v48 }
 0x1ae   :  { %v358_v49 = vpop.permute.xlu0 %357 }
 0x1af   :  { %v360_v50 = vmul.f32 %v358_v49, %v353_v48 }
 0x1b1   :  { %362 = vrot.lane.b32.xlu0 %v360_v50, %s3101_s1 }
 0x223   :  { %v363_v52 = vpop.permute.xlu0 %362 }
 0x224   :  { %v365_v53 = vadd.f32 %v363_v52, %v355_v51 }
 0x226   :  { %2815 = vtanh.f32 %v365_v53 }
 0x230   :  { %v2816_v54 = vpop.eup %2815 }
 0x231   :  { %368 = vrot.lane.b32.xlu1 %v2816_v54, %s3109_s27 }
 0x2a3   :  { %v369_v55 = vpop.permute.xlu1 %368 }
 0x2a4   :  { %v3287_v56 = vmul.f32 %v369_v55, %v353_v48  }
 0x2a6   :  { %v379_v57 = vrot.slane %v3287_v56, %v3238_v10 }
 0x2a8   :  { %380 = vrot.lane.b32.xlu1 %v379_v57, %s3101_s1 }
 0x31a   :  { %v381_v58 = vpop.permute.xlu1 %380 }
 0x31b   :  { %2428 = vmatmul.mubr.msk.f32.vlgmr.msra.gmra.mrb[2].mxu0 %vm275_vm2, %v381_v58 }
 0x31c   :  { %2630 = vmatpush3.bf16.msra.mxu0 %v3243_v15  ;;  %2449 = vmatprep.mubr.msk.f32.mxu0 %vm3107_vm0, %v3108_v4 }
 0x31d   :  { %2631 = vmatprep.subr.bf16.mxu0 %v3105_v1 }
 0x320   :  { %2633 = vmatpush3.bf16.msra.mxu0 %v3255_v30 }
 0x321   :  { %2640 = vmatprep.subr.bf16.mxu0 %v3105_v1 }
 0x3ee   :  { %v450_v60 = vpop.f32.mrb[2].mxu0 }
 0x3ef   :  { %v454_v61 = vadd.f32 %v450_v60, %v244_v59  ;;  %v2429_v62 = vpop.f32.mrb[3].mxu0  ;;  %v253_v60 = vrot.slane %v3278_v37, %v3238_v10 }
 0x3f1   :  { %2817 = vtanh.f32 %v454_v61  ;;  %v455_v0 = vmul.f32 0.5, %v454_v61 }
 0x3f3   :  { %2819 = vtanh.f32 %v455_v0 }
 0x3fb   :  { %v2818_v63 = vpop.eup %2817 }
 0x3fc   :  { %462 = vrot.lane.b32.xlu0 %v2818_v63, %s3109_s27 }
 0x3fd   :  { %v2820_v2 = vpop.eup %2819 }
 0x3fe   :  { %v457_v3 = vadd.f32 1.0, %v2820_v2 }
 0x400   :  { %v458_v5 = vmul.f32 0.5, %v457_v3 }
 0x402   :  { %v460_v8 = vmul.f32 %v458_v5, %v365_v53 }
 0x46e   :  { %v463_v6 = vpop.permute.xlu0 %462 }
 0x46f   :  { %v465_v7 = vmul.f32 %v463_v6, %v458_v5 }
 0x471   :  { %467 = vrot.lane.b32.xlu1 %v465_v7, %s3101_s1 }
 0x4e3   :  { %v468_v9 = vpop.permute.xlu1 %467 }
 0x4e4   :  { %v470_v11 = vadd.f32 %v468_v9, %v460_v8 }
 0x4e6   :  { %2821 = vtanh.f32 %v470_v11 }
 0x4f0   :  { %v2822_v12 = vpop.eup %2821 }
 0x4f1   :  { %473 = vrot.lane.b32.xlu0 %v2822_v12, %s3109_s27 }
 0x563   :  { %v474_v13 = vpop.permute.xlu0 %473 }
 0x564   :  { %v3302_v14 = vmul.f32 %v474_v13, %v458_v5  }
 0x566   :  { %v484_v16 = vrot.slane %v3302_v14, %v3238_v10 }
 0x568   :  { %485 = vrot.lane.b32.xlu1 %v484_v16, %s3101_s1 }
 0x5da   :  { %v486_v17 = vpop.permute.xlu1 %485 }
 0x5db   :  { %2439 = vmatmul.mubr.msk.f32.vlgmr.msra.gmra.mrb[2].mxu1 %vm275_vm2, %v486_v17 }
 0x5dc   :  { %2636 = vmatpush3.bf16.msra.mxu1 %v3243_v15  ;;  %2460 = vmatprep.mubr.msk.f32.mxu1 %vm3107_vm0, %v3108_v4 }
 0x5dd   :  { %2637 = vmatprep.subr.bf16.mxu1 %v3105_v1 }
 0x5e0   :  { %2639 = vmatpush3.bf16.msra.mxu1 %v3255_v30 }
 0x5e1   :  { %2646 = vmatprep.subr.bf16.mxu1 %v3105_v1 }
 0x6ae   :  { %v555_v20 = vpop.f32.mrb[2].mxu1 }
 0x6af   :  { %v559_v21 = vadd.f32 %v555_v20, %v243_v19  ;;  %v2440_v22 = vpop.f32.mrb[3].mxu1  ;;  %v261_v20 = vcombine.high %v253_v60, %v253_v60 }
 0x6b1   :  { %2823 = vtanh.f32 %v559_v21  ;;  %v560_v24 = vmul.f32 0.5, %v559_v21 }
 0x6b3   :  { %2825 = vtanh.f32 %v560_v24 }
 0x6bb   :  { %v2824_v23 = vpop.eup %2823 }
 0x6bc   :  { %567 = vrot.lane.b32.xlu0 %v2824_v23, %s3109_s27 }
 0x6bd   :  { %v2826_v25 = vpop.eup %2825 }
 0x6be   :  { %v562_v26 = vadd.f32 1.0, %v2826_v25 }
 0x6c0   :  { %v563_v27 = vmul.f32 0.5, %v562_v26 }
 0x6c2   :  { %v565_v31 = vmul.f32 %v563_v27, %v470_v11 }
 0x72e   :  { %v568_v28 = vpop.permute.xlu0 %567 }
 0x72f   :  { %v570_v29 = vmul.f32 %v568_v28, %v563_v27 }
 0x731   :  { %572 = vrot.lane.b32.xlu1 %v570_v29, %s3101_s1 }
 0x7a3   :  { %v573_v32 = vpop.permute.xlu1 %572 }
 0x7a4   :  { %v575_v33 = vadd.f32 %v573_v32, %v565_v31 }
 0x7a6   :  { %2827 = vtanh.f32 %v575_v33 }
 0x7b0   :  { %v2828_v34 = vpop.eup %2827 }
 0x7b1   :  { %578 = vrot.lane.b32.xlu0 %v2828_v34, %s3109_s27 }
 0x823   :  { %v579_v35 = vpop.permute.xlu0 %578 }
 0x824   :  { %v3320_v36 = vmul.f32 %v579_v35, %v563_v27  }
 0x826   :  { %v589_v38 = vrot.slane %v3320_v36, %v3238_v10 }
 0x828   :  { %590 = vrot.lane.b32.xlu1 %v589_v38, %s3101_s1 }
 0x89a   :  { %v591_v39 = vpop.permute.xlu1 %590 }
 0x89b   :  { %2450 = vmatmul.mubr.msk.f32.vlgmr.msra.gmra.mrb[4].mxu0 %vm275_vm2, %v591_v39 }
 0x89c   :  { %2642 = vmatpush3.bf16.msra.mxu0 %v3243_v15  ;;  %2471 = vmatprep.mubr.msk.f32.mxu0 %vm3107_vm0, %v3108_v4 }
 0x89d   :  { %2643 = vmatprep.subr.bf16.mxu0 %v3105_v1 }
 0x8a0   :  { %2645 = vmatpush3.bf16.msra.mxu0 %v3255_v30 }
 0x8a1   :  { %2652 = vmatprep.subr.bf16.mxu0 %v3105_v1 }
 0x96e   :  { %v660_v41 = vpop.f32.mrb[4].mxu0 }
 0x96f   :  { %v664_v42 = vadd.f32 %v660_v41, %v245_v40  ;;  %v2451_v43 = vpop.f32.mrb[5].mxu0  ;;  %v246_v40 = vcombine.high %v3278_v37, %v3278_v37 }
 0x971   :  { %2829 = vtanh.f32 %v664_v42  ;;  %v665_v45 = vmul.f32 0.5, %v664_v42  ;;  %v260_v41 = vrot.slane %v246_v40, %v3238_v10 }
 0x973   :  { %2831 = vtanh.f32 %v665_v45 }
 0x97b   :  { %v2830_v44 = vpop.eup %2829 }
 0x97c   :  { %672 = vrot.lane.b32.xlu0 %v2830_v44, %s3109_s27 }
 0x97d   :  { %v2832_v46 = vpop.eup %2831 }
 0x97e   :  { %v667_v47 = vadd.f32 1.0, %v2832_v46 }
 0x980   :  { %v668_v48 = vmul.f32 0.5, %v667_v47 }
 0x982   :  { %v670_v51 = vmul.f32 %v668_v48, %v575_v33 }
 0x9ee   :  { %v673_v49 = vpop.permute.xlu0 %672 }
 0x9ef   :  { %v675_v50 = vmul.f32 %v673_v49, %v668_v48 }
 0x9f1   :  { %677 = vrot.lane.b32.xlu1 %v675_v50, %s3101_s1 }
 0xa63   :  { %v678_v52 = vpop.permute.xlu1 %677 }
 0xa64   :  { %v680_v53 = vadd.f32 %v678_v52, %v670_v51 }
 0xa66   :  { %2833 = vtanh.f32 %v680_v53 }
 0xa70   :  { %v2834_v54 = vpop.eup %2833 }
 0xa71   :  { %683 = vrot.lane.b32.xlu0 %v2834_v54, %s3109_s27 }
 0xae3   :  { %v684_v55 = vpop.permute.xlu0 %683 }
 0xae4   :  { %v3335_v57 = vmul.f32 %v684_v55, %v668_v48  }
 0xae6   :  { %v694_v58 = vrot.slane %v3335_v57, %v3238_v10 }
 0xae8   :  { %695 = vrot.lane.b32.xlu1 %v694_v58, %s3101_s1 }
 0xb5a   :  { %v696_v59 = vpop.permute.xlu1 %695 }
 0xb5b   :  { %2461 = vmatmul.mubr.msk.f32.vlgmr.msra.gmra.mrb[4].mxu1 %vm275_vm2, %v696_v59 }
 0xb5c   :  { %2648 = vmatpush3.bf16.msra.mxu1 %v3243_v15  ;;  %2482 = vmatprep.mubr.msk.f32.mxu1 %vm3107_vm0, %v3108_v4 }
 0xb5d   :  { %2649 = vmatprep.subr.bf16.mxu1 %v3105_v1 }
 0xb60   :  { %2651 = vmatpush3.bf16.msra.mxu1 %v3255_v30 }
 0xc2e   :  { %v765_v61 = vpop.f32.mrb[4].mxu1 }
 0xc2f   :  { %v769_v62 = vadd.f32 %v765_v61, %v253_v60  ;;  %v2462_v63 = vpop.f32.mrb[5].mxu1  ;;  %v262_v61 = vcombine.high %v260_v41, %v260_v41 }
 0xc31   :  { %2835 = vtanh.f32 %v769_v62  ;;  %v770_v2 = vmul.f32 0.5, %v769_v62 }
 0xc33   :  { %2837 = vtanh.f32 %v770_v2 }
 0xc3b   :  { %v2836_v0 = vpop.eup %2835 }
 0xc3c   :  { %777 = vrot.lane.b32.xlu0 %v2836_v0, %s3109_s27 }
 0xc3d   :  { %v2838_v3 = vpop.eup %2837 }
 0xc3e   :  { %v772_v5 = vadd.f32 1.0, %v2838_v3 }
 0xc40   :  { %v773_v6 = vmul.f32 0.5, %v772_v5 }
 0xc42   :  { %v775_v9 = vmul.f32 %v773_v6, %v680_v53 }
 0xcae   :  { %v778_v7 = vpop.permute.xlu0 %777 }
 0xcaf   :  { %v780_v8 = vmul.f32 %v778_v7, %v773_v6 }
 0xcb1   :  { %782 = vrot.lane.b32.xlu1 %v780_v8, %s3101_s1 }
 0xd23   :  { %v783_v11 = vpop.permute.xlu1 %782 }
 0xd24   :  { %v785_v12 = vadd.f32 %v783_v11, %v775_v9 }
 0xd26   :  { %2839 = vtanh.f32 %v785_v12 }
 0xd30   :  { %v2840_v13 = vpop.eup %2839 }
 0xd31   :  { %788 = vrot.lane.b32.xlu0 %v2840_v13, %s3109_s27 }
 0xda3   :  { %v789_v16 = vpop.permute.xlu0 %788 }
 0xda4   :  { %v3351_v17 = vmul.f32 %v789_v16, %v773_v6  }
 0xda6   :  { %v799_v18 = vrot.slane %v3351_v17, %v3238_v10 }
 0xda8   :  { %800 = vrot.lane.b32.xlu1 %v799_v18, %s3101_s1 }
 0xe1a   :  { %v801_v19 = vpop.permute.xlu1 %800 }
 0xe1b   :  { %2472 = vmatmul.mubr.msk.f32.vlgmr.msra.gmra.mrb[6].mxu0 %vm275_vm2, %v801_v19 }
 0xe1c   :  { %2654 = vmatpush3.bf16.msra.mxu0 %v3243_v15  ;;  %2493 = vmatprep.mubr.msk.f32.mxu0 %vm3107_vm0, %v3108_v4 }
 0xe1d   :  { %2655 = vmatprep.subr.bf16.mxu0 %v3105_v1 }
 0xe20   :  { %2657 = vmatpush3.bf16.msra.mxu0 %v3255_v30 }
 0xeee   :  { %v870_v21 = vpop.f32.mrb[6].mxu0 }
 0xeef   :  { %v874_v22 = vadd.f32 %v870_v21, %v261_v20  ;;  %v2473_v23 = vpop.f32.mrb[7].mxu0 }
 0xef1   :  { %2841 = vtanh.f32 %v874_v22  ;;  %v875_v25 = vmul.f32 0.5, %v874_v22 }
 0xef3   :  { %2843 = vtanh.f32 %v875_v25 }
 0xefb   :  { %v2842_v24 = vpop.eup %2841 }
 0xefc   :  { %882 = vrot.lane.b32.xlu0 %v2842_v24, %s3109_s27 }
 0xefd   :  { %v2844_v26 = vpop.eup %2843 }
 0xefe   :  { %v877_v27 = vadd.f32 1.0, %v2844_v26 }
 0xf00   :  { %v878_v15 = vmul.f32 0.5, %v877_v27 }
 0xf02   :  { %v880_v31 = vmul.f32 %v878_v15, %v785_v12 }
 0xf6e   :  { %v883_v28 = vpop.permute.xlu0 %882 }
 0xf6f   :  { %v885_v29 = vmul.f32 %v883_v28, %v878_v15 }
 0xf71   :  { %887 = vrot.lane.b32.xlu1 %v885_v29, %s3101_s1 }
 0xfe3   :  { %v888_v32 = vpop.permute.xlu1 %887 }
 0xfe4   :  { %v890_v30 = vadd.f32 %v888_v32, %v880_v31 }
 0xfe6   :  { %2845 = vtanh.f32 %v890_v30 }
 0xff0   :  { %v2846_v33 = vpop.eup %2845 }
 0xff1   :  { %893 = vrot.lane.b32.xlu0 %v2846_v33, %s3109_s27 }
0x1063   :  { %v894_v34 = vpop.permute.xlu0 %893 }
0x1064   :  { %v896_v35 = vmul.f32 %v894_v34, %v878_v15  }
0x1066   :  { %v904_v38 = vrot.slane %v896_v35, %v3238_v10 }
0x1068   :  { %905 = vrot.lane.b32.xlu1 %v904_v38, %s3101_s1 }
0x10da   :  { %v906_v39 = vpop.permute.xlu1 %905 }
0x10db   :  { %2483 = vmatmul.mubr.msk.f32.vlgmr.msra.gmra.mrb[6].mxu1 %vm275_vm2, %v906_v39 }
0x11ae   :  { %v975_v42 = vpop.f32.mrb[6].mxu1 }
0x11af   :  { %v979_v43 = vadd.f32 %v975_v42, %v260_v41  ;;  %v2484_v44 = vpop.f32.mrb[7].mxu1 }
0x11b1   :  { %2847 = vtanh.f32 %v979_v43  ;;  %v980_v46 = vmul.f32 0.5, %v979_v43 }
0x11b3   :  { %2849 = vtanh.f32 %v980_v46 }
0x11bb   :  { %v2848_v45 = vpop.eup %2847 }
0x11bc   :  { %987 = vrot.lane.b32.xlu0 %v2848_v45, %s3109_s27 }
0x11bd   :  { %v2850_v47 = vpop.eup %2849 }
0x11be   :  { %v982_v48 = vadd.f32 1.0, %v2850_v47 }
0x11c0   :  { %v983_v49 = vmul.f32 0.5, %v982_v48 }
0x11c2   :  { %v985_v52 = vmul.f32 %v983_v49, %v890_v30 }
0x122e   :  { %v988_v50 = vpop.permute.xlu0 %987 }
0x122f   :  { %v990_v51 = vmul.f32 %v988_v50, %v983_v49 }
0x1231   :  { %992 = vrot.lane.b32.xlu1 %v990_v51, %s3101_s1 }
0x12a3   :  { %v993_v37 = vpop.permute.xlu1 %992 }
0x12a4   :  { %v995_v53 = vadd.f32 %v993_v37, %v985_v52 }
0x12a6   :  { %2851 = vtanh.f32 %v995_v53 }
0x12b0   :  { %v2852_v54 = vpop.eup %2851 }
0x12b1   :  { %998 = vrot.lane.b32.xlu0 %v2852_v54, %s3109_s27 }
0x1323   :  { %v999_v55 = vpop.permute.xlu0 %998 }
0x1324   :  { %v1001_v58 = vmul.f32 %v999_v55, %v983_v49  }
0x1326   :  { %v1009_v59 = vrot.slane %v1001_v58, %v3238_v10 }
0x1328   :  { %1010 = vrot.lane.b32.xlu1 %v1009_v59, %s3101_s1 }
0x139a   :  { %v1011_v60 = vpop.permute.xlu1 %1010 }
0x139b   :  { %2494 = vmatmul.mubr.msk.f32.vlgmr.msra.gmra.mrb[8].mxu0 %vm275_vm2, %v1011_v60 }
0x146e   :  { %v1080_v62 = vpop.f32.mrb[8].mxu0 }
0x146f   :  { %v1084_v63 = vadd.f32 %v1080_v62, %v262_v61  ;;  %v2495_v0 = vpop.f32.mrb[9].mxu0 }
0x1471   :  { %2853 = vtanh.f32 %v1084_v63  ;;  %v1085_v3 = vmul.f32 0.5, %v1084_v63 }
0x1473   :  { %2855 = vtanh.f32 %v1085_v3 }
0x147b   :  { %v2854_v2 = vpop.eup %2853 }
0x147c   :  { %1092 = vrot.lane.b32.xlu0 %v2854_v2, %s3109_s27 }
0x147d   :  { %v2856_v5 = vpop.eup %2855 }
0x147e   :  { %v1087_v6 = vadd.f32 1.0, %v2856_v5 }
0x1480   :  { %v1088_v7 = vmul.f32 0.5, %v1087_v6 }
0x1482   :  { %v1090_v11 = vmul.f32 %v1088_v7, %v995_v53 }
0x14ee   :  { %v1093_v8 = vpop.permute.xlu0 %1092 }
0x14ef   :  { %v1095_v9 = vmul.f32 %v1093_v8, %v1088_v7 }
0x14f1   :  { %1097 = vrot.lane.b32.xlu1 %v1095_v9, %s3101_s1 }
0x1563   :  { %v1098_v12 = vpop.permute.xlu1 %1097 }
0x1564   :  { %v1100_v13 = vadd.f32 %v1098_v12, %v1090_v11 }
0x1566   :  { %2857 = vtanh.f32 %v1100_v13 }
0x1570   :  { %v2858_v16 = vpop.eup %2857 }
0x1571   :  { %1103 = vrot.lane.b32.xlu0 %v2858_v16, %s3109_s27 }
0x15e3   :  { %v1104_v18 = vpop.permute.xlu0 %1103 }
0x15e4   :  { %v1106_v19 = vmul.f32 %v1104_v18, %v1088_v7  }
0x15e5 LB: > { %v1148_v20 = vcombine.low %v3091_v56, %v3087_v14  ;;  %v1149_v21 = vcombine.low %v3083_v36, %v3079_v57  ;;  %s2293_s28 = sshll.u32 %s3095_s3, 5  ;;  %v1165_v27 = vcombine.low %v3075_v17, %v3071_v35  ;;  %v1166_v15 = vcombine.low %v3067_v58, %v3063_v19  ;;  %s3111_s29 = smov 32   ;;  %s3095_s3 = sphi %s3401_s3, %s1112_s3   ;;  %v3091_v56 = vphi %v3287_v56, %v3461_v56   ;;  %v3087_v14 = vphi %v3302_v14, %v3476_v14   ;;  %v3083_v36 = vphi %v3320_v36, %v3624_v36   ;;  %v3079_v57 = vphi %v3335_v57, %v3509_v57   ;;  %v3075_v17 = vphi %v3351_v17, %v3525_v17   ;;  %v3071_v35 = vphi %v896_v35, %v3623_v35   ;;  %v3067_v58 = vphi %v1001_v58, %v2031_v58   ;;  %v3063_v19 = vphi %v1106_v19, %v3622_v19  }
0x15e6   : > { %s1122_s0 = scalar_lea.vmem [#allocation7], %s2293_s28  ;;  %s1127_s24 = scalar_lea.vmem [#allocation8], %s2293_s28  ;;  %v3110_v36 = vmov 0.0|0.0   ;;  %vm3112_vm3 = vmmov 0   ;;  %v3113_v39 = vmov 0.0  }
0x15e7   : > { %v1156_v22 = vrot.slane %v1148_v20, %v3238_v10  ;;  %v1163_v23 = vrot.slane %v1149_v21, %v3238_v10  ;;  %v1123_v24 = vld [vmem:[%s1122_s0] sm:$0xff]  ;;  %v1124_v25 = vld [vmem:[%s1122_s0 + $0x8] sm:$0xff]  ;;  %v1130_v29 = vld [vmem:[%s1127_s24 + $0x10] sm:$0xff]  ;;  %2666 = vmatprep.subr.bf16.mxu1 %v3110_v36  ;;  %v1173_v57 = vrot.slane %v1165_v27, %v3238_v10  ;;  %v1180_v34 = vrot.slane %v1166_v15, %v3238_v10  ;;  %s1132_s12 = scalar_lea.vmem %s3618_s6, %s3095_s3  ;;  %s3114_s10 = smov 64  }
0x15e8   : > { %v1128_v26 = vld [vmem:[%s1127_s24] sm:$0xff]  ;;  %v1129_v28 = vld [vmem:[%s1127_s24 + $0x8] sm:$0xff]  ;;  %v2658_v31 = vpack.c.bf16 %v1124_v25, %v1123_v24  ;;  %v1131_v30 = vld [vmem:[%s1127_s24 + $0x18] sm:$0xff]  ;;  %2515 = vmatprep.mubr.msk.f32.mxu1 %vm3112_vm3, %v3113_v39  ;;  %s1112_s3 = sadd.s32 1, %s3095_s3  }
0x15e9   : > { %v1164_v32 = vcombine.low %v1156_v22, %v1163_v23  ;;  %v3417_v33 = vpack.c.bf16 %v1129_v28, %v1128_v26  ;;  %v1125_v56 = vld [vmem:[%s1122_s0 + $0x10] sm:$0xff]  ;;  %v1126_v14 = vld [vmem:[%s1122_s0 + $0x18] sm:$0xff]  ;;  %v1181_v17 = vcombine.low %v1173_v57, %v1180_v34  ;;  %v3423_v35 = vpack.c.bf16 %v1131_v30, %v1130_v29  ;;  %v2294_v44 = vld [vmem:[%s1132_s12] ss:$0 sm:$0xff]  ;;  %p1109_p4 = scmp.ge.s32.totalorder %s1112_s3, 7  }
0x15ea   : > { %2659 = vmatprep.subr.bf16.mxu0 %v2658_v31  ;;  %v2662_v38 = vpack.c.bf16 %v1126_v14, %v1125_v56  ;;  %s3115_s18 = smov (%p1109_p4), [#allocation10]   ;;  %vm2230_vm4 = vcmask (%p1109_p4), 58368  }
0x15eb   : > { %1182 = vrot.lane.b32.xlu0 %v1164_v32, %s3111_s29  ;;  %2661 = vmatpush3.bf16.msra.mxu0 %v2658_v31  ;;  %s2238_s21 = sshll.u32 (%p1109_p4), %s3115_s18, 4  ;;  %s2239_s21 = int_to_ptr.vmem [resolvable:$true] %s2238_s21 }
0x15ec   : > { %2663 = vmatprep.subr.bf16.mxu0 %v2662_v38  ;;  %2668 = vmatpush3.bf16.msra.mxu1 %v3417_v33  ;;  %p3000_p6 = scmp.lt.s32.totalorder (%p1109_p4), %s2239_s21, %s2239_s21 }
0x15ed   : > { %2669 = vmatprep.subr.bf16.mxu1 %v3110_v36 }
0x15ef   : > { %1184 = vrot.lane.b32.xlu0 %v1181_v17, %s3111_s29  ;;  %2665 = vmatpush3.bf16.msra.mxu0 %v2662_v38 }
0x15f0   : > { %2671 = vmatpush3.bf16.msra.mxu1 %v3423_v35  ;;  %2672 = vmatprep.subr.bf16.mxu0 %v3110_v36 }
0x15f1   : > { %2678 = vmatprep.subr.bf16.mxu1 %v3110_v36 }
0x15f3   : > { %2516 = vmatmul.mubr.f32.vlgmr.msra.gmra.mrb[0].mxu1 %v3113_v39 }
0x15f4   : > { %2680 = vmatpush3.bf16.msra.mxu1 %v3417_v33  ;;  %2537 = vmatprep.mubr.msk.f32.mxu1 %vm3112_vm3, %v3113_v39 }
0x15f5   : > { %2681 = vmatprep.subr.bf16.mxu1 %v3110_v36 }
0x15f8   : > { %2683 = vmatpush3.bf16.msra.mxu1 %v3423_v35 }
0x15f9   : > { %2690 = vmatprep.subr.bf16.mxu1 %v3110_v36 }
0x165d   : > { %v1183_v40 = vpop.permute.xlu0 %1182 }
0x165e   : > { %2504 = vmatprep.mubr.msk.f32.mxu0 %vm275_vm2, %v1183_v40 }
0x1661   : > { %v1185_v41 = vpop.permute.xlu0 %1184 }
0x1662   : > { %2505 = vmatmul.mubr.msk.f32.vlgmr.msra.gmra.mrb[0].mxu0 %vm275_vm2, %v1185_v41 }
0x1663   : > { %2674 = vmatpush3.bf16.msra.mxu0 %v3417_v33  ;;  %2526 = vmatprep.mubr.msk.f32.mxu0 %vm3112_vm3, %v3113_v39 }
0x1664   : > { %2675 = vmatprep.subr.bf16.mxu0 %v3110_v36 }
0x1667   : > { %2677 = vmatpush3.bf16.msra.mxu0 %v3423_v35 }
0x1668   : > { %2684 = vmatprep.subr.bf16.mxu0 %v3110_v36 }
0x16c6   : > { %v1375_v42 = vpop.f32.mrb[0].mxu1 }
0x16c7   : > { %v2517_v43 = vpop.f32.mrb[1].mxu1 }
0x1735   : > { %v2506_v45 = vpop.f32.mrb[0].mxu0 }
0x1736   : > { %v3452_v46 = vadd.f32 %v2506_v45, %v2294_v44  ;;  %v1256_v47 = vpop.f32.mrb[1].mxu0 }
0x1737   : > { %v3454_v48 = vadd.f32 %v2294_v44, %v1256_v47 }
0x1739   : > { %v1274_v49 = vrot.slane %v3454_v48, %v3238_v10  ;;  %v1267_v26 = vcombine.high %v3454_v48, %v3454_v48 }
0x173b   : > { %v1379_v50 = vadd.f32 %v1375_v42, %v1274_v49  ;;  %v1282_v3 = vcombine.high %v1274_v49, %v1274_v49  ;;  %v1281_v27 = vrot.slane %v1267_v26, %v3238_v10 }
0x173d   : > { %2859 = vtanh.f32 %v1379_v50  ;;  %v1380_v52 = vmul.f32 0.5, %v1379_v50  ;;  %v1283_v49 = vcombine.high %v1281_v27, %v1281_v27 }
0x173f   : > { %2861 = vtanh.f32 %v1380_v52 }
0x1747   : > { %v2860_v51 = vpop.eup %2859 }
0x1748   : > { %1387 = vrot.lane.b32.xlu1 %v2860_v51, %s3114_s10 }
0x1749   : > { %v2862_v37 = vpop.eup %2861 }
0x174a   : > { %v1382_v53 = vadd.f32 1.0, %v2862_v37 }
0x174c   : > { %v1383_v54 = vmul.f32 0.5, %v1382_v53 }
0x174e   : > { %v1385_v59 = vmul.f32 0.0, %v1383_v54 }
0x17ba   : > { %v1388_v55 = vpop.permute.xlu1 %1387 }
0x17bb   : > { %v1390_v58 = vmul.f32 %v1388_v55, %v1383_v54 }
0x17bd   : > { %1392 = vrot.lane.b32.xlu1 %v1390_v58, %s3111_s29 }
0x182f   : > { %v1393_v60 = vpop.permute.xlu1 %1392 }
0x1830   : > { %v1395_v61 = vadd.f32 %v1393_v60, %v1385_v59 }
0x1832   : > { %2863 = vtanh.f32 %v1395_v61 }
0x183c   : > { %v2864_v62 = vpop.eup %2863 }
0x183d   : > { %1398 = vrot.lane.b32.xlu0 %v2864_v62, %s3114_s10 }
0x18af   : > { %v1399_v63 = vpop.permute.xlu0 %1398 }
0x18b0   : > { %v3461_v56 = vmul.f32 %v1399_v63, %v1383_v54  }
0x18b2   : > { %v1409_v0 = vrot.slane %v3461_v56, %v3238_v10 }
0x18b4   : > { %1410 = vrot.lane.b32.xlu1 %v1409_v0, %s3111_s29 }
0x1926   : > { %v1411_v2 = vpop.permute.xlu1 %1410 }
0x1927   : > { %2527 = vmatmul.mubr.msk.f32.vlgmr.msra.gmra.mrb[2].mxu0 %vm275_vm2, %v1411_v2 }
0x1928   : > { %2686 = vmatpush3.bf16.msra.mxu0 %v3417_v33  ;;  %2548 = vmatprep.mubr.msk.f32.mxu0 %vm3112_vm3, %v3113_v39 }
0x1929   : > { %2687 = vmatprep.subr.bf16.mxu0 %v3110_v36 }
0x192c   : > { %2689 = vmatpush3.bf16.msra.mxu0 %v3423_v35 }
0x192d   : > { %2696 = vmatprep.subr.bf16.mxu0 %v3110_v36 }
0x19fa   : > { %v1480_v5 = vpop.f32.mrb[2].mxu0 }
0x19fb   : > { %v1484_v6 = vadd.f32 %v1480_v5, %v1282_v3  ;;  %v2528_v7 = vpop.f32.mrb[3].mxu0 }
0x19fd   : > { %2865 = vtanh.f32 %v1484_v6  ;;  %v1485_v9 = vmul.f32 0.5, %v1484_v6  ;;  %v1291_v6 = vrot.slane %v3452_v46, %v3238_v10 }
0x19ff   : > { %2867 = vtanh.f32 %v1485_v9 }
0x1a07   : > { %v2866_v8 = vpop.eup %2865 }
0x1a08   : > { %1492 = vrot.lane.b32.xlu0 %v2866_v8, %s3114_s10 }
0x1a09   : > { %v2868_v11 = vpop.eup %2867 }
0x1a0a   : > { %v1487_v12 = vadd.f32 1.0, %v2868_v11 }
0x1a0c   : > { %v1488_v13 = vmul.f32 0.5, %v1487_v12 }
0x1a0e   : > { %v1490_v19 = vmul.f32 %v1488_v13, %v1395_v61 }
0x1a7a   : > { %v1493_v16 = vpop.permute.xlu0 %1492 }
0x1a7b   : > { %v1495_v18 = vmul.f32 %v1493_v16, %v1488_v13 }
0x1a7d   : > { %1497 = vrot.lane.b32.xlu1 %v1495_v18, %s3111_s29 }
0x1aef   : > { %v1498_v20 = vpop.permute.xlu1 %1497 }
0x1af0   : > { %v1500_v21 = vadd.f32 %v1498_v20, %v1490_v19 }
0x1af2   : > { %2869 = vtanh.f32 %v1500_v21 }
0x1afc   : > { %v2870_v22 = vpop.eup %2869 }
0x1afd   : > { %1503 = vrot.lane.b32.xlu0 %v2870_v22, %s3114_s10 }
0x1b6f   : > { %v1504_v23 = vpop.permute.xlu0 %1503 }
0x1b70   : > { %v3476_v14 = vmul.f32 %v1504_v23, %v1488_v13  }
0x1b72   : > { %v1514_v24 = vrot.slane %v3476_v14, %v3238_v10 }
0x1b74   : > { %1515 = vrot.lane.b32.xlu1 %v1514_v24, %s3111_s29 }
0x1be6   : > { %v1516_v25 = vpop.permute.xlu1 %1515 }
0x1be7   : > { %2538 = vmatmul.mubr.msk.f32.vlgmr.msra.gmra.mrb[2].mxu1 %vm275_vm2, %v1516_v25 }
0x1be8   : > { %2692 = vmatpush3.bf16.msra.mxu1 %v3417_v33  ;;  %2559 = vmatprep.mubr.msk.f32.mxu1 %vm3112_vm3, %v3113_v39 }
0x1be9   : > { %2693 = vmatprep.subr.bf16.mxu1 %v3110_v36 }
0x1bec   : > { %2695 = vmatpush3.bf16.msra.mxu1 %v3423_v35 }
0x1bed   : > { %2702 = vmatprep.subr.bf16.mxu1 %v3110_v36 }
0x1cba   : > { %v1585_v15 = vpop.f32.mrb[2].mxu1 }
0x1cbb   : > { %v1589_v28 = vadd.f32 %v1585_v15, %v1281_v27  ;;  %v2539_v29 = vpop.f32.mrb[3].mxu1  ;;  %v1299_v15 = vcombine.high %v1291_v6, %v1291_v6 }
0x1cbd   : > { %2871 = vtanh.f32 %v1589_v28  ;;  %v1590_v32 = vmul.f32 0.5, %v1589_v28 }
0x1cbf   : > { %2873 = vtanh.f32 %v1590_v32 }
0x1cc7   : > { %v2872_v31 = vpop.eup %2871 }
0x1cc8   : > { %1597 = vrot.lane.b32.xlu0 %v2872_v31, %s3114_s10 }
0x1cc9   : > { %v2874_v30 = vpop.eup %2873 }
0x1cca   : > { %v1592_v57 = vadd.f32 1.0, %v2874_v30 }
0x1ccc   : > { %v1593_v34 = vmul.f32 0.5, %v1592_v57 }
0x1cce   : > { %v1595_v40 = vmul.f32 %v1593_v34, %v1500_v21 }
0x1d3a   : > { %v1598_v38 = vpop.permute.xlu0 %1597 }
0x1d3b   : > { %v1600_v17 = vmul.f32 %v1598_v38, %v1593_v34 }
0x1d3d   : > { %1602 = vrot.lane.b32.xlu1 %v1600_v17, %s3111_s29 }
0x1daf   : > { %v1603_v41 = vpop.permute.xlu1 %1602 }
0x1db0   : > { %v1605_v42 = vadd.f32 %v1603_v41, %v1595_v40 }
0x1db2   : > { %2875 = vtanh.f32 %v1605_v42 }
0x1dbc   : > { %v2876_v43 = vpop.eup %2875 }
0x1dbd   : > { %1608 = vrot.lane.b32.xlu0 %v2876_v43, %s3114_s10 }
0x1e2f   : > { %v1609_v44 = vpop.permute.xlu0 %1608 }
0x1e30   : > { %v3494_v45 = vmul.f32 %v1609_v44, %v1593_v34  }
0x1e32   : > { %v1619_v47 = vrot.slane %v3494_v45, %v3238_v10 }
0x1e34   : > { %1620 = vrot.lane.b32.xlu1 %v1619_v47, %s3111_s29 }
0x1ea6   : > { %v1621_v48 = vpop.permute.xlu1 %1620 }
0x1ea7   : > { %2549 = vmatmul.mubr.msk.f32.vlgmr.msra.gmra.mrb[4].mxu0 %vm275_vm2, %v1621_v48 }
0x1ea8   : > { %2698 = vmatpush3.bf16.msra.mxu0 %v3417_v33  ;;  %2570 = vmatprep.mubr.msk.f32.mxu0 %vm3112_vm3, %v3113_v39 }
0x1ea9   : > { %2699 = vmatprep.subr.bf16.mxu0 %v3110_v36 }
0x1eac   : > { %2701 = vmatpush3.bf16.msra.mxu0 %v3423_v35 }
0x1ead   : > { %2708 = vmatprep.subr.bf16.mxu0 %v3110_v36 }
0x1f7a   : > { %v1690_v50 = vpop.f32.mrb[4].mxu0 }
0x1f7b   : > { %v1694_v51 = vadd.f32 %v1690_v50, %v1283_v49  ;;  %v2550_v52 = vpop.f32.mrb[5].mxu0  ;;  %v1284_v49 = vcombine.high %v3452_v46, %v3452_v46 }
0x1f7d   : > { %2877 = vtanh.f32 %v1694_v51  ;;  %v1695_v53 = vmul.f32 0.5, %v1694_v51  ;;  %v1298_v50 = vrot.slane %v1284_v49, %v3238_v10 }
0x1f7f   : > { %2879 = vtanh.f32 %v1695_v53 }
0x1f87   : > { %v2878_v37 = vpop.eup %2877 }
0x1f88   : > { %1702 = vrot.lane.b32.xlu0 %v2878_v37, %s3114_s10 }
0x1f89   : > { %v2880_v54 = vpop.eup %2879 }
0x1f8a   : > { %v1697_v55 = vadd.f32 1.0, %v2880_v54 }
0x1f8c   : > { %v1698_v58 = vmul.f32 0.5, %v1697_v55 }
0x1f8e   : > { %v1700_v61 = vmul.f32 %v1698_v58, %v1605_v42 }
0x1ffa   : > { %v1703_v59 = vpop.permute.xlu0 %1702 }
0x1ffb   : > { %v1705_v60 = vmul.f32 %v1703_v59, %v1698_v58 }
0x1ffd   : > { %1707 = vrot.lane.b32.xlu1 %v1705_v60, %s3111_s29 }
0x206f   : > { %v1708_v62 = vpop.permute.xlu1 %1707 }
0x2070   : > { %v1710_v63 = vadd.f32 %v1708_v62, %v1700_v61 }
0x2072   : > { %2881 = vtanh.f32 %v1710_v63 }
0x207c   : > { %v2882_v0 = vpop.eup %2881 }
0x207d   : > { %1713 = vrot.lane.b32.xlu0 %v2882_v0, %s3114_s10 }
0x20ef   : > { %v1714_v2 = vpop.permute.xlu0 %1713 }
0x20f0   : > { %v3509_v57 = vmul.f32 %v1714_v2, %v1698_v58  }
0x20f2   : > { %v1724_v3 = vrot.slane %v3509_v57, %v3238_v10 }
0x20f4   : > { %1725 = vrot.lane.b32.xlu1 %v1724_v3, %s3111_s29 }
0x2166   : > { %v1726_v5 = vpop.permute.xlu1 %1725 }
0x2167   : > { %2560 = vmatmul.mubr.msk.f32.vlgmr.msra.gmra.mrb[4].mxu1 %vm275_vm2, %v1726_v5 }
0x2168   : > { %2704 = vmatpush3.bf16.msra.mxu1 %v3417_v33  ;;  %2581 = vmatprep.mubr.msk.f32.mxu1 %vm3112_vm3, %v3113_v39 }
0x2169   : > { %2705 = vmatprep.subr.bf16.mxu1 %v3110_v36 }
0x216c   : > { %2707 = vmatpush3.bf16.msra.mxu1 %v3423_v35 }
0x223a   : > { %v1795_v7 = vpop.f32.mrb[4].mxu1 }
0x223b   : > { %v1799_v8 = vadd.f32 %v1795_v7, %v1291_v6  ;;  %v2561_v9 = vpop.f32.mrb[5].mxu1  ;;  %v1300_v6 = vcombine.high %v1298_v50, %v1298_v50 }
0x223d   : > { %2883 = vtanh.f32 %v1799_v8  ;;  %v1800_v12 = vmul.f32 0.5, %v1799_v8 }
0x223f   : > { %2885 = vtanh.f32 %v1800_v12 }
0x2247   : > { %v2884_v11 = vpop.eup %2883 }
0x2248   : > { %1807 = vrot.lane.b32.xlu0 %v2884_v11, %s3114_s10 }
0x2249   : > { %v2886_v13 = vpop.eup %2885 }
0x224a   : > { %v1802_v16 = vadd.f32 1.0, %v2886_v13 }
0x224c   : > { %v1803_v18 = vmul.f32 0.5, %v1802_v16 }
0x224e   : > { %v1805_v21 = vmul.f32 %v1803_v18, %v1710_v63 }
0x22ba   : > { %v1808_v19 = vpop.permute.xlu0 %1807 }
0x22bb   : > { %v1810_v20 = vmul.f32 %v1808_v19, %v1803_v18 }
0x22bd   : > { %1812 = vrot.lane.b32.xlu1 %v1810_v20, %s3111_s29 }
0x232f   : > { %v1813_v22 = vpop.permute.xlu1 %1812 }
0x2330   : > { %v1815_v23 = vadd.f32 %v1813_v22, %v1805_v21 }
0x2332   : > { %2887 = vtanh.f32 %v1815_v23 }
0x233c   : > { %v2888_v24 = vpop.eup %2887 }
0x233d   : > { %1818 = vrot.lane.b32.xlu0 %v2888_v24, %s3114_s10 }
0x23af   : > { %v1819_v25 = vpop.permute.xlu0 %1818 }
0x23b0   : > { %v3525_v17 = vmul.f32 %v1819_v25, %v1803_v18  }
0x23b2   : > { %v1829_v26 = vrot.slane %v3525_v17, %v3238_v10  ;;  %v2304_v17 = vld [vmem:[%s3620_s8] ss:$0 sm:$0xff] (%p1109_p4) }
0x23b4   : > { %1830 = vrot.lane.b32.xlu1 %v1829_v26, %s3111_s29 }
0x2426   : > { %v1831_v27 = vpop.permute.xlu1 %1830 }
0x2427   : > { %2571 = vmatmul.mubr.msk.f32.vlgmr.msra.gmra.mrb[6].mxu0 %vm275_vm2, %v1831_v27 }
0x2428   : > { %2710 = vmatpush3.bf16.msra.mxu0 %v3417_v33  ;;  %2592 = vmatprep.mubr.msk.f32.mxu0 %vm3112_vm3, %v3113_v39 }
0x2429   : > { %2711 = vmatprep.subr.bf16.mxu0 %v3110_v36 }
0x242c   : > { %2713 = vmatpush3.bf16.msra.mxu0 %v3423_v35 }
0x242d   :  { %2714 = vmatprep.subr.bf16.mxu0 (%p1109_p4), %v3105_v1 }
0x24fa   : > { %v1900_v28 = vpop.f32.mrb[6].mxu0 }
0x24fb   : > { %v1904_v29 = vadd.f32 %v1900_v28, %v1299_v15  ;;  %v2572_v31 = vpop.f32.mrb[7].mxu0  ;;  %v2137_v15 = vld [vmem:[%s3619_s7] sm:$0xff] (%p1109_p4)  ;;  %v2139_v28 = vld [vmem:[%s3619_s7 + $0x10] sm:$0xff] (%p1109_p4) }
0x24fd   : > { %2889 = vtanh.f32 %v1904_v29  ;;  %v1905_v30 = vmul.f32 0.5, %v1904_v29 }
0x24ff   : > { %2891 = vtanh.f32 %v1905_v30 }
0x2507   : > { %v2890_v32 = vpop.eup %2889 }
0x2508   : > { %1912 = vrot.lane.b32.xlu0 %v2890_v32, %s3114_s10 }
0x2509   : > { %v2892_v34 = vpop.eup %2891 }
0x250a   : > { %v1907_v38 = vadd.f32 1.0, %v2892_v34 }
0x250c   : > { %v1908_v33 = vmul.f32 0.5, %v1907_v38 }
0x250e   : > { %v1910_v36 = vmul.f32 %v1908_v33, %v1815_v23 }
0x257a   : > { %v1913_v40 = vpop.permute.xlu0 %1912 }
0x257b   : > { %v1915_v41 = vmul.f32 %v1913_v40, %v1908_v33 }
0x257d   : > { %1917 = vrot.lane.b32.xlu1 %v1915_v41, %s3111_s29 }
0x25ef   : > { %v1918_v39 = vpop.permute.xlu1 %1917 }
0x25f0   : > { %v1920_v35 = vadd.f32 %v1918_v39, %v1910_v36  ;;  %v3624_v36 = vmov %v3494_v45  ;;  %v2138_v45 = vld [vmem:[%s3619_s7 + $0x8] sm:$0xff] (%p1109_p4) }
0x25f1   :  { %v2715_v56 = vpack.c.bf16 (%p1109_p4), %v2138_v45, %v2137_v15 }
0x25f2   : > { %2893 = vtanh.f32 %v1920_v35 }
0x25fc   : > { %v2894_v42 = vpop.eup %2893 }
0x25fd   : > { %1923 = vrot.lane.b32.xlu0 %v2894_v42, %s3114_s10 }
0x266f   : > { %v1924_v43 = vpop.permute.xlu0 %1923 }
0x2670   : > { %v1926_v44 = vmul.f32 %v1924_v43, %v1908_v33  }
0x2672   : > { %v1934_v47 = vrot.slane %v1926_v44, %v3238_v10 }
0x2674   : > { %1935 = vrot.lane.b32.xlu1 %v1934_v47, %s3111_s29 }
0x26e6   : > { %v1936_v48 = vpop.permute.xlu1 %1935 }
0x26e7   : > { %2582 = vmatmul.mubr.msk.f32.vlgmr.msra.gmra.mrb[6].mxu1 %vm275_vm2, %v1936_v48 }
0x27ba   : > { %v2005_v51 = vpop.f32.mrb[6].mxu1 }
0x27bb   : > { %v2009_v52 = vadd.f32 %v2005_v51, %v1298_v50  ;;  %v2583_v37 = vpop.f32.mrb[7].mxu1 }
0x27bd   : > { %2895 = vtanh.f32 %v2009_v52  ;;  %v2010_v54 = vmul.f32 0.5, %v2009_v52 }
0x27bf   : > { %2897 = vtanh.f32 %v2010_v54 }
0x27c7   : > { %v2896_v53 = vpop.eup %2895 }
0x27c8   : > { %2017 = vrot.lane.b32.xlu0 %v2896_v53, %s3114_s10 }
0x27c9   : > { %v2898_v55 = vpop.eup %2897 }
0x27ca   : > { %v2012_v58 = vadd.f32 1.0, %v2898_v55 }
0x27cc   : > { %v2013_v59 = vmul.f32 0.5, %v2012_v58 }
0x27ce   : > { %v2015_v62 = vmul.f32 %v2013_v59, %v1920_v35  ;;  %v3623_v35 = vmov %v1926_v44 }
0x283a   : > { %v2018_v60 = vpop.permute.xlu0 %2017 }
0x283b   : > { %v2020_v61 = vmul.f32 %v2018_v60, %v2013_v59 }
0x283d   : > { %2022 = vrot.lane.b32.xlu1 %v2020_v61, %s3111_s29 }
0x28af   : > { %v2023_v46 = vpop.permute.xlu1 %2022 }
0x28b0   : > { %v2025_v63 = vadd.f32 %v2023_v46, %v2015_v62 }
0x28b2   : > { %2899 = vtanh.f32 %v2025_v63 }
0x28bc   : > { %v2900_v0 = vpop.eup %2899 }
0x28bd   : > { %2028 = vrot.lane.b32.xlu0 %v2900_v0, %s3114_s10 }
0x292f   : > { %v2029_v2 = vpop.permute.xlu0 %2028 }
0x2930   : > { %v2031_v58 = vmul.f32 %v2029_v2, %v2013_v59  }
0x2932   : > { %v2039_v3 = vrot.slane %v2031_v58, %v3238_v10 }
0x2934   : > { %2040 = vrot.lane.b32.xlu1 %v2039_v3, %s3111_s29 }
0x29a6   : > { %v2041_v5 = vpop.permute.xlu1 %2040 }
0x29a7   : > { %2593 = vmatmul.mubr.msk.f32.vlgmr.msra.gmra.mrb[8].mxu0 %vm275_vm2, %v2041_v5 }
0x29a8   :  { %2603 = vmatprep.mubr.msk.f32.mxu0 (%p1109_p4), %vm3107_vm0, %v3108_v4  ;;  %2716 = vmatpush3.bf16.msra.mxu0 (%p1109_p4), %v2715_v56 }
0x29a9   :  { %2717 = vmatprep.subr.bf16.mxu0 (%p1109_p4), %v3105_v1 }
0x2a7a   : > { %v2110_v7 = vpop.f32.mrb[8].mxu0 }
0x2a7b   : > { %v2114_v8 = vadd.f32 %v2110_v7, %v1300_v6  ;;  %v2594_v9 = vpop.f32.mrb[9].mxu0 }
0x2a7d   : > { %2901 = vtanh.f32 %v2114_v8  ;;  %v2115_v12 = vmul.f32 0.5, %v2114_v8 }
0x2a7f   : > { %2903 = vtanh.f32 %v2115_v12 }
0x2a87   : > { %v2902_v11 = vpop.eup %2901 }
0x2a88   : > { %2122 = vrot.lane.b32.xlu0 %v2902_v11, %s3114_s10 }
0x2a89   : > { %v2904_v13 = vpop.eup %2903 }
0x2a8a   : > { %v2117_v16 = vadd.f32 1.0, %v2904_v13 }
0x2a8c   : > { %v2118_v18 = vmul.f32 0.5, %v2117_v16 }
0x2a8e   : > { %v2120_v21 = vmul.f32 %v2118_v18, %v2025_v63 }
0x2afa   : > { %v2123_v19 = vpop.permute.xlu0 %2122 }
0x2afb   : > { %v2125_v20 = vmul.f32 %v2123_v19, %v2118_v18 }
0x2afd   : > { %2127 = vrot.lane.b32.xlu1 %v2125_v20, %s3111_s29 }
0x2b6f   : > { %v2128_v22 = vpop.permute.xlu1 %2127 }
0x2b70   : > { %v2130_v23 = vadd.f32 %v2128_v22, %v2120_v21 }
0x2b72   : > { %2905 = vtanh.f32 %v2130_v23 }
0x2b7c   : > { %v2906_v24 = vpop.eup %2905 }
0x2b7d   : > { %2133 = vrot.lane.b32.xlu0 %v2906_v24, %s3114_s10 }
0x2bec   :  { %1111 = sbr.rel (!%p1109_p4) target bundleno = 5605 (0x15e5), region = 82 }
0x2bef   : > { %v2134_v25 = vpop.permute.xlu0 %2133 }
0x2bf0   : > { %v2136_v26 = vmul.f32 %v2134_v25, %v2118_v18  }
0x2bf2   : > { %v3622_v19 = vmov %v2136_v26  ;;  %v2155_v27 = vrot.slane (%p1109_p4), %v2136_v26, %v3238_v10  ;;  %v2140_v10 = vld [vmem:[%s3619_s7 + $0x18] sm:$0xff] (%p1109_p4)  ;;  %s2995_s7 = scalar_lea.vmem (%p1109_p4), %s2239_s21, 32 }
0x2bf3   :  { %v2718_v14 = vpack.c.bf16 %v2140_v10, %v2139_v28  ;;  %p2996_p5 = scmp.ne.s32.totalorder %s2239_s21, %s2995_s7  ;;  %p3001_p7 = scmp.lt.s32.totalorder %s2995_s7, %s2995_s7 }
0x2bf4   :  { %2156 = vrot.lane.b32.xlu0 %v2155_v27, %s3101_s1 }
0x2bf5   :  { %2719 = vmatpush3.bf16.msra.mxu0 %v2718_v14  ;;  %p3002_p8 = por %p3001_p7, %p3000_p6 }
0x2bf7   :  { %p3003_p9 = pnand %p3002_p8, %p2996_p5 }
0x2c66   :  { %v2157_v57 = vpop.permute.xlu0 %2156 }
0x2c67   :  { %2604 = vmatmul.mubr.msk.f32.vlgmr.msra.gmra.mrb[0].mxu0 %vm275_vm2, %v2157_v57 }
0x2d3a   :  { %v2226_v4 = vpop.f32.mrb[0].mxu0 }
0x2d3b   :  { %v2227_v29 = vadd.f32 %v2304_v17, %v2226_v4  ;;  %v2605_v31 = vpop.f32.mrb[1].mxu0 }
0x2d3d   :  { %2231 = vst.msk [vmem:[#allocation10] sm:$0x3] %vm2230_vm4, %v2227_v29 }
0x2d3e   :  { %3006 = shalt.err (!%p3003_p9)
}
0x2d3f   :  { %s3007_s23 = scalar_lea.hbm %s3621_s9, 32 }
0x2d40   :  { %p3008_p10 = scmp.ne.s32.totalorder %s3621_s9, %s3007_s23  ;;  %p3011_p11 = scmp.lt.u32.totalorder %s3007_s23, %s3621_s9 }
0x2d42   :  { %p3013_p12 = pnand %p3011_p11, %p3008_p10 }
0x2d44   :  { %3016 = shalt.err (!%p3013_p12)
}
0x2d45   :  { %2241 = dma.vmem_to_hbm [thread:$0]  %s2239_s21, 32, %s3621_s9, [#allocation4]  }
0x2d46   :  { %3059 = dma.done.wait [#allocation4], 32  }
0x2d47   :  { %3060 = vsyncadd [#allocation4], 4294967264 }
0x2d48   :  { %2245 = vsyncpa [#allocation3], 1 }
0x2d49   :  { %2246 = vsyncpa [#allocation6], 1 }
0x2d4a   :  { %2247 = vsyncpa [#allocation9], 1 }
0x2d4b   :  { %2248 = vsyncpa [#allocation4], 1 }

</bundles_post_ra>
